<compile_context>
chip_gen: v5e
topology: v5e:2x2
jax: 0.10.0
libtpu: 0.0.40
codegen_flags: <defaults>
</compile_context>

<pallas_src>
import jax
import jax.numpy as jnp
from jax import lax
from jax.experimental import pallas as pl
from jax.experimental.pallas import tpu as pltpu

LRELU_SLOPE = 0.2
SLAB_W = 128                      # lane width of the packed parameter slabs


def _round_up(x, m):
    return (x + m - 1) // m * m


# ----------------------- trace-time weight preparation -----------------------

def _conv_row_toeplitz(w_hwio, i, wo, wp):
    """(Wp*cin, wo*cout) matrix for kernel row i of a 4x4 / stride-2 / pad-1 conv."""
    kh, kw, cin, cout = w_hwio.shape
    t = jnp.zeros((wp, cin, wo, cout), jnp.float32)
    ow = jnp.arange(wo)
    for j in range(kw):
        t = t.at[j + 2 * ow, :, ow, :].set(w_hwio[i, j].astype(jnp.float32))
    return t.reshape(wp * cin, wo * cout)


def _pool_col_toeplitz(cin, wn, wp):
    """(Wp*cin, wn*cin) 0/1 matrix: column 3-tap sum of AvgPool2d(3, 2, 1)."""
    t = jnp.zeros((wp, cin, wn, cin), jnp.float32)
    x = jnp.arange(wn)
    eye = jnp.eye(cin, dtype=jnp.float32)
    for dj in range(3):
        t = t.at[dj + 2 * x, :, x, :].set(eye)
    return t.reshape(wp * cin, wn * cin)


def _conv1x1_toeplitz(w_hwio, w1):
    """(w1*cin, w1) block-diagonal matrix for the final Conv2d(cin, 1, 1)."""
    cin = w_hwio.shape[2]
    t = jnp.zeros((w1, cin, w1), jnp.float32)
    x = jnp.arange(w1)
    t = t.at[x, :, x].set(w_hwio[0, 0, :, 0].astype(jnp.float32))
    return t.reshape(w1 * cin, w1)


class _SlabPacker:
    """Packs many small 2-D param pieces into one (rows, 128) slab."""

    def __init__(self):
        self._rows = 0
        self._pieces = []

    def add(self, arr):
        arr = jnp.asarray(arr, jnp.float32)
        if arr.ndim == 1:
            arr = arr[None, :]
        r, c = arr.shape
        assert c <= SLAB_W, (r, c)
        off = self._rows
        self._pieces.append((off, arr))
        self._rows = _round_up(off + r, 8)     # keep sublane-aligned row offsets
        return (off, r, c)

    def finalize(self, dtype):
        slab = jnp.zeros((max(self._rows, 8), SLAB_W), jnp.float32)
        for off, arr in self._pieces:
            slab = slab.at[off:off + arr.shape[0], :arr.shape[1]].set(arr)
        return slab.astype(dtype)


# --------------------------------- forward -----------------------------------

def ms_image_dis_forward(x_nchw, scales_params, *, use_bf16=False):
    """Forward pass of MsImageDis; returns the per-scale logit maps in NCHW.

    scales_params: per scale, (list of (w_hwio, bias) for the 4x4/s2/p1 convs,
                               (w_hwio, bias) for the final 1x1 conv).
    use_bf16: cast MXU operands (activation patches + weight matrices) to bf16
              (recommended on v6e/v7x); accumulation and elementwise stay f32.
    """
    x = jnp.transpose(x_nchw, (0, 2, 3, 1)).astype(jnp.float32)   # NCHW -> NHWC
    n, h, w, c_in = x.shape
    num_scales = len(scales_params)
    mm_dtype = jnp.bfloat16 if use_bf16 else jnp.float32

    # Scale-0 input, zero-padded by 1 and stored as (N, Hp, Wp*C):
    # rows on sublanes, flattened (padded col, channel) on lanes.
    xp = jnp.pad(x, ((0, 0), (1, 1), (1, 1), (0, 0)))
    xp = xp.reshape(n, h + 2, (w + 2) * c_in)

    tpack = _SlabPacker()     # matmul operands (bf16-able)
    apack = _SlabPacker()     # f32-only: biases, pool reciprocal counts

    scale_meta = []
    scratch_shapes = []
    out_shapes = []

    cur_h, cur_w = h, w
    for s, (convs, final) in enumerate(scales_params):
        meta = {'layers': []}
        ih, iw, icin = cur_h, cur_w, c_in
        for li, (wm, bm) in enumerate(convs):
            kh, kw, cin, cout = wm.shape
            assert (kh, kw) == (4, 4) and cin == icin
            assert ih % 2 == 0 and iw % 2 == 0, (ih, iw)
            ho, wo = ih // 2, iw // 2
            wp = iw + 2
            taps = [tpack.add(_conv_row_toeplitz(wm, i, wo, wp)) for i in range(4)]
            bias = apack.add(jnp.tile(bm.astype(jnp.float32), wo))
            lmeta = {'ho': ho, 'cout': cout, 'k_rows': wp * cin,
                     'out_w': wo * cout, 'taps': taps, 'bias': bias,
                     'dst_scratch': None}
            if li + 1 < len(convs):            # output feeds another 4x4 conv
                lmeta['dst_scratch'] = len(scratch_shapes)
                scratch_shapes.append(
                    pltpu.VMEM((n, ho + 2, (wo + 2) * cout), jnp.float32))
            meta['layers'].append(lmeta)
            ih, iw, icin = ho, wo, cout

        # final nn.Conv2d(dim, 1, 1, 1, 0) -- no activation
        wf, bf = final
        meta['final'] = {'h1': ih, 'w1': iw,
                         't': tpack.add(_conv1x1_toeplitz(wf, iw)),
                         'b': apack.add(jnp.tile(bf.astype(jnp.float32), iw))}
        out_shapes.append(jax.ShapeDtypeStruct((n * ih, iw), jnp.float32))

        # AvgPool2d(3, 2, 1, count_include_pad=False) feeding the next scale.
        # (The PyTorch module also pools after the last scale but never uses
        # that result -> skipped.)
        if s + 1 < num_scales:
            hn, wn = cur_h // 2, cur_w // 2
            wp0 = cur_w + 2
            ones = jnp.ones((1, cur_h, cur_w, 1), jnp.float32)
            cnt = lax.reduce_window(ones, 0.0, lax.add, (1, 3, 3, 1),
                                    (1, 2, 2, 1),
                                    [(0, 0), (1, 1), (1, 1), (0, 0)])
            inv = jnp.repeat(1.0 / cnt[0, :, :, 0], c_in, axis=1)   # (hn, wn*cin)
            meta['pool'] = {'hn': hn, 'k_rows': wp0 * c_in,
                            'out_w': wn * c_in,
                            't': tpack.add(_pool_col_toeplitz(c_in, wn, wp0)),
                            'inv': apack.add(inv),
                            'dst_scratch': len(scratch_shapes)}
            scratch_shapes.append(
                pltpu.VMEM((n, hn + 2, (wn + 2) * c_in), jnp.float32))
        else:
            meta['pool'] = None
        scale_meta.append(meta)
        cur_h, cur_w = cur_h // 2, cur_w // 2

    tslab = tpack.finalize(mm_dtype)
    aslab = apack.finalize(jnp.float32)
    n_out = num_scales

    def _slc(ref, ent):
        off, r, c = ent
        return ref[off:off + r, 0:c]

    # ------------------------------ fused kernel ------------------------------
    def kernel(*refs):
        xpad_ref, t_ref, a_ref = refs[0], refs[1], refs[2]
        out_refs = refs[3:3 + n_out]
        scr_refs = refs[3 + n_out:]

        # Zero the padded scratches ONCE so their 1-element borders read as the
        # conv/pool zero padding; only interiors are written below.
        for scr in scr_refs:
            scr[...] = jnp.zeros(scr.shape, jnp.float32)

        src = xpad_ref
        for s, meta in enumerate(scale_meta):
            # -- downsample this scale's input for the next scale (f32) --
            nxt_src = None
            if meta['pool'] is not None:
                pm = meta['pool']
                acc = jnp.zeros((n * pm['hn'], pm['out_w']), jnp.float32)
                pt = _slc(t_ref, pm['t']).astype(jnp.float32)
                for di in range(3):
                    rows = src[:, pl.ds(di, pm['hn'], stride=2), :]
                    acc = acc + jnp.dot(rows.reshape(n * pm['hn'], pm['k_rows']),
                                        pt, preferred_element_type=jnp.float32)
                inv = _slc(a_ref, pm['inv'])                       # (hn, wn*cin)
                pooled = acc.reshape(n, pm['hn'], pm['out_w']) * inv[None]
                dst = scr_refs[pm['dst_scratch']]
                dst[:, 1:pm['hn'] + 1, c_in:c_in + pm['out_w']] = pooled
                nxt_src = dst

            # -- n_layer Conv2dBlock(4x4, s2, p1, norm='none', lrelu) --
            cur = src
            val = None
            for lm in meta['layers']:
                acc = jnp.zeros((n * lm['ho'], lm['out_w']), jnp.float32)
                for i, ent in enumerate(lm['taps']):
                    rows = cur[:, pl.ds(i, lm['ho'], stride=2), :]
                    patch = rows.reshape(n * lm['ho'], lm['k_rows']).astype(mm_dtype)
                    acc = acc + jnp.dot(patch, _slc(t_ref, ent),
                                        preferred_element_type=jnp.float32)
                act = acc + _slc(a_ref, lm['bias'])                # (1, out_w) bcast
                act = jnp.where(act >= 0.0, act, LRELU_SLOPE * act)
                if lm['dst_scratch'] is not None:
                    dst = scr_refs[lm['dst_scratch']]
                    dst[:, 1:lm['ho'] + 1,
                        lm['cout']:lm['cout'] + lm['out_w']] = (
                            act.reshape(n, lm['ho'], lm['out_w']))
                    cur = dst
                else:
                    val = act                                      # feeds the 1x1

            # -- final 1x1 conv, logits stored lane-dense as (N*Ho, Wo) --
            fm = meta['final']
            logits = jnp.dot(val.astype(mm_dtype), _slc(t_ref, fm['t']),
                             preferred_element_type=jnp.float32)
            out_refs[s][...] = logits + _slc(a_ref, fm['b'])

            src = nxt_src

    vmem = pl.BlockSpec(memory_space=pltpu.MemorySpace.VMEM)
    outs = pl.pallas_call(
        kernel,
        out_shape=tuple(out_shapes),
        in_specs=[vmem, vmem, vmem],
        out_specs=tuple(vmem for _ in range(n_out)),
        scratch_shapes=scratch_shapes,
        compiler_params=pltpu.CompilerParams(vmem_limit_bytes=32 * 1024 * 1024),
    )(xp, tslab, aslab)

    results = []
    for meta, o in zip(scale_meta, outs):
        h1, w1 = meta['final']['h1'], meta['final']['w1']
        results.append(o.reshape(n, h1, w1)[:, None, :, :])        # NCHW (C=1)
    return results


# ------------------------------ parameter setup ------------------------------

def make_ms_image_dis_params(key, input_dim, dim, n_layer, num_scales):
    scales = []
    for _ in range(num_scales):
        convs = []
        cin, cout = input_dim, dim
        for _ in range(n_layer):
            key, kw_, kb_ = jax.random.split(key, 3)
            wm = jax.random.normal(kw_, (4, 4, cin, cout), jnp.float32) * 0.05
            bm = jax.random.normal(kb_, (cout,), jnp.float32) * 0.05
            convs.append((wm, bm))
            cin, cout = cout, cout * 2
        key, kw_, kb_ = jax.random.split(key, 3)
        wf = jax.random.normal(kw_, (1, 1, cin, 1), jnp.float32) * 0.05
        bf = jax.random.normal(kb_, (1,), jnp.float32) * 0.05
        scales.append((convs, (wf, bf)))
    return scales


# ------------------------ pure-JAX reference (checking) -----------------------

def ref_forward(x_nchw, scales_params):
    x = jnp.transpose(x_nchw, (0, 2, 3, 1)).astype(jnp.float32)
    outs = []
    for convs, (wf, bf) in scales_params:
        hcur = x
        for wm, bm in convs:
            hcur = lax.conv_general_dilated(
                hcur, wm, (2, 2), [(1, 1), (1, 1)],
                dimension_numbers=("NHWC", "HWIO", "NHWC"))
            hcur = hcur + bm.reshape(1, 1, 1, -1)
            hcur = jnp.where(hcur >= 0, hcur, LRELU_SLOPE * hcur)
        hcur = lax.conv_general_dilated(
            hcur, wf, (1, 1), [(0, 0), (0, 0)],
            dimension_numbers=("NHWC", "HWIO", "NHWC"))
        hcur = hcur + bf.reshape(1, 1, 1, -1)
        outs.append(jnp.transpose(hcur, (0, 3, 1, 2)))
        # AvgPool2d(3, 2, 1, count_include_pad=False)
        s = lax.reduce_window(x, 0.0, lax.add, (1, 3, 3, 1), (1, 2, 2, 1),
                              [(0, 0), (1, 1), (1, 1), (0, 0)])
        ones = jnp.ones_like(x[:1, :, :, :1])
        cnt = lax.reduce_window(ones, 0.0, lax.add, (1, 3, 3, 1), (1, 2, 2, 1),
                                [(0, 0), (1, 1), (1, 1), (0, 0)])
        x = s / cnt
    return outs


if __name__ == "__main__":
    key = jax.random.PRNGKey(0)
    k_x, k_p = jax.random.split(key)

    input_dim = 4
    x = jax.random.normal(k_x, (2, input_dim, 16, 16), jnp.float32)
    params = make_ms_image_dis_params(k_p, input_dim=input_dim, dim=8,
                                      n_layer=2, num_scales=2)

    refs = ref_forward(x, params)
    expected_shapes = [(2, 1, 4, 4), (2, 1, 2, 2)]

    # f32 path (exact check against the lax.conv reference)
    fwd = jax.jit(lambda inp: ms_image_dis_forward(inp, params, use_bf16=False))
    outs = fwd(x)
    outs = [jax.block_until_ready(o) for o in outs]
    for o, r, es in zip(outs, refs, expected_shapes):
        assert o.shape == es, (o.shape, es)
        err = float(jnp.max(jnp.abs(o - r)))
        assert jnp.allclose(o, r, atol=1e-4, rtol=1e-4), err

    # bf16 MXU-operand path (recommended on v6e/v7x); loose sanity check.
    fwd_bf16 = jax.jit(lambda inp: ms_image_dis_forward(inp, params, use_bf16=True))
    outs_bf16 = fwd_bf16(x)
    outs_bf16 = [jax.block_until_ready(o) for o in outs_bf16]
    for o, r in zip(outs_bf16, refs):
        err = float(jnp.max(jnp.abs(o - r)))
        assert jnp.allclose(o, r, atol=5e-2), err

    print("KERNEL_OK")
</pallas_src>

<mosaic_0001>
module attributes {stable_mosaic.version = 11 : i64} {
  func.func @kernel(%arg0: memref<2x18x72xf32, #tpu.memory_space<vmem>>, %arg1: memref<1128x128xf32, #tpu.memory_space<vmem>>, %arg2: memref<56x128xf32, #tpu.memory_space<vmem>>, %arg3: memref<8x4xf32, #tpu.memory_space<vmem>>, %arg4: memref<4x2xf32, #tpu.memory_space<vmem>>, %arg5: memref<2x10x80xf32, #tpu.memory_space<vmem>>, %arg6: memref<2x10x40xf32, #tpu.memory_space<vmem>>, %arg7: memref<2x6x48xf32, #tpu.memory_space<vmem>>) attributes {dimension_semantics = [], scalar_prefetch = 0 : i64, scratch_operands = 3 : i64, tpu.core_type = #tpu.core_type<tc>} {
    %cst = arith.constant 0.000000e+00 : f32
    %0 = vector.broadcast %cst : f32 to vector<2x10x80xf32>
    %c0 = arith.constant 0 : index
    %c0_0 = arith.constant 0 : index
    %c0_1 = arith.constant 0 : index
    %1 = vector.load %arg5[%c0, %c0_0, %c0_1] : memref<2x10x80xf32, #tpu.memory_space<vmem>>, vector<2x10x80xf32>
    tpu.vector_store %arg5[%c0, %c0_0, %c0_1], %0 {strides = array<i32>} : memref<2x10x80xf32, #tpu.memory_space<vmem>>, vector<2x10x80xf32>,
    %cst_2 = arith.constant 0.000000e+00 : f32
    %2 = vector.broadcast %cst_2 : f32 to vector<2x10x40xf32>
    %c0_3 = arith.constant 0 : index
    %c0_4 = arith.constant 0 : index
    %c0_5 = arith.constant 0 : index
    %3 = vector.load %arg6[%c0_3, %c0_4, %c0_5] : memref<2x10x40xf32, #tpu.memory_space<vmem>>, vector<2x10x40xf32>
    tpu.vector_store %arg6[%c0_3, %c0_4, %c0_5], %2 {strides = array<i32>} : memref<2x10x40xf32, #tpu.memory_space<vmem>>, vector<2x10x40xf32>,
    %cst_6 = arith.constant 0.000000e+00 : f32
    %4 = vector.broadcast %cst_6 : f32 to vector<2x6x48xf32>
    %c0_7 = arith.constant 0 : index
    %c0_8 = arith.constant 0 : index
    %c0_9 = arith.constant 0 : index
    %5 = vector.load %arg7[%c0_7, %c0_8, %c0_9] : memref<2x6x48xf32, #tpu.memory_space<vmem>>, vector<2x6x48xf32>
    tpu.vector_store %arg7[%c0_7, %c0_8, %c0_9], %4 {strides = array<i32>} : memref<2x6x48xf32, #tpu.memory_space<vmem>>, vector<2x6x48xf32>,
    %cst_10 = arith.constant 0.000000e+00 : f32
    %6 = vector.broadcast %cst_10 : f32 to vector<16x32xf32>
    %c672 = arith.constant 672 : index
    %c0_11 = arith.constant 0 : index
    %7 = vector.load %arg1[%c672, %c0_11] : memref<1128x128xf32, #tpu.memory_space<vmem>>, vector<72x32xf32>
    %c0_12 = arith.constant 0 : index
    %c0_13 = arith.constant 0 : index
    %c0_14 = arith.constant 0 : index
    %8 = tpu.strided_load %arg0[%c0_12, %c0_13, %c0_14] {strides = array<i32: 1, 2, 1>} : memref<2x18x72xf32, #tpu.memory_space<vmem>>, vector<2x8x72xf32>
    %9 = vector.shape_cast %8 : vector<2x8x72xf32> to vector<16x72xf32>
    %cst_15 = arith.constant dense<0.000000e+00> : vector<16x32xf32>
    %10 = tpu.matmul %9, %7, %cst_15 {dimension_numbers = #tpu.dot_dimension_numbers<[1], [0], [0], [1], [0, 0, 1, 1], [], []>} : vector<16x72xf32>, vector<72x32xf32>, vector<16x32xf32> -> vector<16x32xf32>
    %11 = arith.addf %6, %10 : vector<16x32xf32>
    %c0_16 = arith.constant 0 : index
    %c1 = arith.constant 1 : index
    %c0_17 = arith.constant 0 : index
    %12 = tpu.strided_load %arg0[%c0_16, %c1, %c0_17] {strides = array<i32: 1, 2, 1>} : memref<2x18x72xf32, #tpu.memory_space<vmem>>, vector<2x8x72xf32>
    %13 = vector.shape_cast %12 : vector<2x8x72xf32> to vector<16x72xf32>
    %cst_18 = arith.constant dense<0.000000e+00> : vector<16x32xf32>
    %14 = tpu.matmul %13, %7, %cst_18 {dimension_numbers = #tpu.dot_dimension_numbers<[1], [0], [0], [1], [0, 0, 1, 1], [], []>} : vector<16x72xf32>, vector<72x32xf32>, vector<16x32xf32> -> vector<16x32xf32>
    %15 = arith.addf %11, %14 : vector<16x32xf32>
    %c0_19 = arith.constant 0 : index
    %c2 = arith.constant 2 : index
    %c0_20 = arith.constant 0 : index
    %16 = tpu.strided_load %arg0[%c0_19, %c2, %c0_20] {strides = array<i32: 1, 2, 1>} : memref<2x18x72xf32, #tpu.memory_space<vmem>>, vector<2x8x72xf32>
    %17 = vector.shape_cast %16 : vector<2x8x72xf32> to vector<16x72xf32>
    %cst_21 = arith.constant dense<0.000000e+00> : vector<16x32xf32>
    %18 = tpu.matmul %17, %7, %cst_21 {dimension_numbers = #tpu.dot_dimension_numbers<[1], [0], [0], [1], [0, 0, 1, 1], [], []>} : vector<16x72xf32>, vector<72x32xf32>, vector<16x32xf32> -> vector<16x32xf32>
    %19 = arith.addf %15, %18 : vector<16x32xf32>
    %c24 = arith.constant 24 : index
    %c0_22 = arith.constant 0 : index
    %20 = vector.load %arg2[%c24, %c0_22] : memref<56x128xf32, #tpu.memory_space<vmem>>, vector<8x32xf32>
    %21 = vector.shape_cast %19 : vector<16x32xf32> to vector<2x8x32xf32>
    %22 = vector.shape_cast %20 : vector<8x32xf32> to vector<1x8x32xf32>
    %23 = vector.broadcast %22 : vector<1x8x32xf32> to vector<2x8x32xf32>
    %24 = arith.mulf %21, %23 : vector<2x8x32xf32>
    %c0_23 = arith.constant 0 : index
    %c1_24 = arith.constant 1 : index
    %c4 = arith.constant 4 : index
    %25 = vector.load %arg6[%c0_23, %c1_24, %c4] : memref<2x10x40xf32, #tpu.memory_space<vmem>>, vector<2x8x32xf32>
    tpu.vector_store %arg6[%c0_23, %c1_24, %c4], %24 {strides = array<i32>} : memref<2x10x40xf32, #tpu.memory_space<vmem>>, vector<2x8x32xf32>,
    %cst_25 = arith.constant 0.000000e+00 : f32
    %26 = vector.broadcast %cst_25 : f32 to vector<16x64xf32>
    %c0_26 = arith.constant 0 : index
    %c0_27 = arith.constant 0 : index
    %c0_28 = arith.constant 0 : index
    %27 = tpu.strided_load %arg0[%c0_26, %c0_27, %c0_28] {strides = array<i32: 1, 2, 1>} : memref<2x18x72xf32, #tpu.memory_space<vmem>>, vector<2x8x72xf32>
    %28 = vector.shape_cast %27 : vector<2x8x72xf32> to vector<16x72xf32>
    %c0_29 = arith.constant 0 : index
    %c0_30 = arith.constant 0 : index
    %29 = vector.load %arg1[%c0_29, %c0_30] : memref<1128x128xf32, #tpu.memory_space<vmem>>, vector<72x64xf32>
    %cst_31 = arith.constant dense<0.000000e+00> : vector<16x64xf32>
    %30 = tpu.matmul %28, %29, %cst_31 {dimension_numbers = #tpu.dot_dimension_numbers<[1], [0], [0], [1], [0, 0, 1, 1], [], []>} : vector<16x72xf32>, vector<72x64xf32>, vector<16x64xf32> -> vector<16x64xf32>
    %31 = arith.addf %26, %30 : vector<16x64xf32>
    %c0_32 = arith.constant 0 : index
    %c1_33 = arith.constant 1 : index
    %c0_34 = arith.constant 0 : index
    %32 = tpu.strided_load %arg0[%c0_32, %c1_33, %c0_34] {strides = array<i32: 1, 2, 1>} : memref<2x18x72xf32, #tpu.memory_space<vmem>>, vector<2x8x72xf32>
    %33 = vector.shape_cast %32 : vector<2x8x72xf32> to vector<16x72xf32>
    %c72 = arith.constant 72 : index
    %c0_35 = arith.constant 0 : index
    %34 = vector.load %arg1[%c72, %c0_35] : memref<1128x128xf32, #tpu.memory_space<vmem>>, vector<72x64xf32>
    %cst_36 = arith.constant dense<0.000000e+00> : vector<16x64xf32>
    %35 = tpu.matmul %33, %34, %cst_36 {dimension_numbers = #tpu.dot_dimension_numbers<[1], [0], [0], [1], [0, 0, 1, 1], [], []>} : vector<16x72xf32>, vector<72x64xf32>, vector<16x64xf32> -> vector<16x64xf32>
    %36 = arith.addf %31, %35 : vector<16x64xf32>
    %c0_37 = arith.constant 0 : index
    %c2_38 = arith.constant 2 : index
    %c0_39 = arith.constant 0 : index
    %37 = tpu.strided_load %arg0[%c0_37, %c2_38, %c0_39] {strides = array<i32: 1, 2, 1>} : memref<2x18x72xf32, #tpu.memory_space<vmem>>, vector<2x8x72xf32>
    %38 = vector.shape_cast %37 : vector<2x8x72xf32> to vector<16x72xf32>
    %c144 = arith.constant 144 : index
    %c0_40 = arith.constant 0 : index
    %39 = vector.load %arg1[%c144, %c0_40] : memref<1128x128xf32, #tpu.memory_space<vmem>>, vector<72x64xf32>
    %cst_41 = arith.constant dense<0.000000e+00> : vector<16x64xf32>
    %40 = tpu.matmul %38, %39, %cst_41 {dimension_numbers = #tpu.dot_dimension_numbers<[1], [0], [0], [1], [0, 0, 1, 1], [], []>} : vector<16x72xf32>, vector<72x64xf32>, vector<16x64xf32> -> vector<16x64xf32>
    %41 = arith.addf %36, %40 : vector<16x64xf32>
    %c0_42 = arith.constant 0 : index
    %c3 = arith.constant 3 : index
    %c0_43 = arith.constant 0 : index
    %42 = tpu.strided_load %arg0[%c0_42, %c3, %c0_43] {strides = array<i32: 1, 2, 1>} : memref<2x18x72xf32, #tpu.memory_space<vmem>>, vector<2x8x72xf32>
    %43 = vector.shape_cast %42 : vector<2x8x72xf32> to vector<16x72xf32>
    %c216 = arith.constant 216 : index
    %c0_44 = arith.constant 0 : index
    %44 = vector.load %arg1[%c216, %c0_44] : memref<1128x128xf32, #tpu.memory_space<vmem>>, vector<72x64xf32>
    %cst_45 = arith.constant dense<0.000000e+00> : vector<16x64xf32>
    %45 = tpu.matmul %43, %44, %cst_45 {dimension_numbers = #tpu.dot_dimension_numbers<[1], [0], [0], [1], [0, 0, 1, 1], [], []>} : vector<16x72xf32>, vector<72x64xf32>, vector<16x64xf32> -> vector<16x64xf32>
    %46 = arith.addf %41, %45 : vector<16x64xf32>
    %c0_46 = arith.constant 0 : index
    %c0_47 = arith.constant 0 : index
    %47 = vector.load %arg2[%c0_46, %c0_47] : memref<56x128xf32, #tpu.memory_space<vmem>>, vector<1x64xf32>
    %48 = vector.broadcast %47 : vector<1x64xf32> to vector<16x64xf32>
    %49 = arith.addf %46, %48 : vector<16x64xf32>
    %cst_48 = arith.constant 0.000000e+00 : f32
    %50 = vector.broadcast %cst_48 : f32 to vector<16x64xf32>
    %51 = arith.cmpf oge, %49, %50 : vector<16x64xf32>
    %cst_49 = arith.constant 2.000000e-01 : f32
    %52 = vector.broadcast %cst_49 : f32 to vector<16x64xf32>
    %53 = arith.mulf %52, %49 : vector<16x64xf32>
    %54 = arith.select %51, %49, %53 : vector<16x64xi1>, vector<16x64xf32>
    %55 = vector.shape_cast %54 : vector<16x64xf32> to vector<2x8x64xf32>
    %c0_50 = arith.constant 0 : index
    %c1_51 = arith.constant 1 : index
    %c8 = arith.constant 8 : index
    %56 = vector.load %arg5[%c0_50, %c1_51, %c8] : memref<2x10x80xf32, #tpu.memory_space<vmem>>, vector<2x8x64xf32>
    tpu.vector_store %arg5[%c0_50, %c1_51, %c8], %55 {strides = array<i32>} : memref<2x10x80xf32, #tpu.memory_space<vmem>>, vector<2x8x64xf32>,
    %cst_52 = arith.constant 0.000000e+00 : f32
    %57 = vector.broadcast %cst_52 : f32 to vector<8x64xf32>
    %c0_53 = arith.constant 0 : index
    %c0_54 = arith.constant 0 : index
    %c0_55 = arith.constant 0 : index
    %58 = tpu.strided_load %arg5[%c0_53, %c0_54, %c0_55] {strides = array<i32: 1, 2, 1>} : memref<2x10x80xf32, #tpu.memory_space<vmem>>, vector<2x4x80xf32>
    %59 = vector.shape_cast %58 : vector<2x4x80xf32> to vector<8x80xf32>
    %c288 = arith.constant 288 : index
    %c0_56 = arith.constant 0 : index
    %60 = vector.load %arg1[%c288, %c0_56] : memref<1128x128xf32, #tpu.memory_space<vmem>>, vector<80x64xf32>
    %cst_57 = arith.constant dense<0.000000e+00> : vector<8x64xf32>
    %61 = tpu.matmul %59, %60, %cst_57 {dimension_numbers = #tpu.dot_dimension_numbers<[1], [0], [0], [1], [0, 0, 1, 1], [], []>} : vector<8x80xf32>, vector<80x64xf32>, vector<8x64xf32> -> vector<8x64xf32>
    %62 = arith.addf %57, %61 : vector<8x64xf32>
    %c0_58 = arith.constant 0 : index
    %c1_59 = arith.constant 1 : index
    %c0_60 = arith.constant 0 : index
    %63 = tpu.strided_load %arg5[%c0_58, %c1_59, %c0_60] {strides = array<i32: 1, 2, 1>} : memref<2x10x80xf32, #tpu.memory_space<vmem>>, vector<2x4x80xf32>
    %64 = vector.shape_cast %63 : vector<2x4x80xf32> to vector<8x80xf32>
    %c368 = arith.constant 368 : index
    %c0_61 = arith.constant 0 : index
    %65 = vector.load %arg1[%c368, %c0_61] : memref<1128x128xf32, #tpu.memory_space<vmem>>, vector<80x64xf32>
    %cst_62 = arith.constant dense<0.000000e+00> : vector<8x64xf32>
    %66 = tpu.matmul %64, %65, %cst_62 {dimension_numbers = #tpu.dot_dimension_numbers<[1], [0], [0], [1], [0, 0, 1, 1], [], []>} : vector<8x80xf32>, vector<80x64xf32>, vector<8x64xf32> -> vector<8x64xf32>
    %67 = arith.addf %62, %66 : vector<8x64xf32>
    %c0_63 = arith.constant 0 : index
    %c2_64 = arith.constant 2 : index
    %c0_65 = arith.constant 0 : index
    %68 = tpu.strided_load %arg5[%c0_63, %c2_64, %c0_65] {strides = array<i32: 1, 2, 1>} : memref<2x10x80xf32, #tpu.memory_space<vmem>>, vector<2x4x80xf32>
    %69 = vector.shape_cast %68 : vector<2x4x80xf32> to vector<8x80xf32>
    %c448 = arith.constant 448 : index
    %c0_66 = arith.constant 0 : index
    %70 = vector.load %arg1[%c448, %c0_66] : memref<1128x128xf32, #tpu.memory_space<vmem>>, vector<80x64xf32>
    %cst_67 = arith.constant dense<0.000000e+00> : vector<8x64xf32>
    %71 = tpu.matmul %69, %70, %cst_67 {dimension_numbers = #tpu.dot_dimension_numbers<[1], [0], [0], [1], [0, 0, 1, 1], [], []>} : vector<8x80xf32>, vector<80x64xf32>, vector<8x64xf32> -> vector<8x64xf32>
    %72 = arith.addf %67, %71 : vector<8x64xf32>
    %c0_68 = arith.constant 0 : index
    %c3_69 = arith.constant 3 : index
    %c0_70 = arith.constant 0 : index
    %73 = tpu.strided_load %arg5[%c0_68, %c3_69, %c0_70] {strides = array<i32: 1, 2, 1>} : memref<2x10x80xf32, #tpu.memory_space<vmem>>, vector<2x4x80xf32>
    %74 = vector.shape_cast %73 : vector<2x4x80xf32> to vector<8x80xf32>
    %c528 = arith.constant 528 : index
    %c0_71 = arith.constant 0 : index
    %75 = vector.load %arg1[%c528, %c0_71] : memref<1128x128xf32, #tpu.memory_space<vmem>>, vector<80x64xf32>
    %cst_72 = arith.constant dense<0.000000e+00> : vector<8x64xf32>
    %76 = tpu.matmul %74, %75, %cst_72 {dimension_numbers = #tpu.dot_dimension_numbers<[1], [0], [0], [1], [0, 0, 1, 1], [], []>} : vector<8x80xf32>, vector<80x64xf32>, vector<8x64xf32> -> vector<8x64xf32>
    %77 = arith.addf %72, %76 : vector<8x64xf32>
    %c8_73 = arith.constant 8 : index
    %c0_74 = arith.constant 0 : index
    %78 = vector.load %arg2[%c8_73, %c0_74] : memref<56x128xf32, #tpu.memory_space<vmem>>, vector<1x64xf32>
    %79 = vector.broadcast %78 : vector<1x64xf32> to vector<8x64xf32>
    %80 = arith.addf %77, %79 : vector<8x64xf32>
    %cst_75 = arith.constant 0.000000e+00 : f32
    %81 = vector.broadcast %cst_75 : f32 to vector<8x64xf32>
    %82 = arith.cmpf oge, %80, %81 : vector<8x64xf32>
    %cst_76 = arith.constant 2.000000e-01 : f32
    %83 = vector.broadcast %cst_76 : f32 to vector<8x64xf32>
    %84 = arith.mulf %83, %80 : vector<8x64xf32>
    %85 = arith.select %82, %80, %84 : vector<8x64xi1>, vector<8x64xf32>
    %c608 = arith.constant 608 : index
    %c0_77 = arith.constant 0 : index
    %86 = vector.load %arg1[%c608, %c0_77] : memref<1128x128xf32, #tpu.memory_space<vmem>>, vector<64x4xf32>
    %cst_78 = arith.constant dense<0.000000e+00> : vector<8x4xf32>
    %87 = tpu.matmul %85, %86, %cst_78 {dimension_numbers = #tpu.dot_dimension_numbers<[1], [0], [0], [1], [0, 0, 1, 1], [], []>} : vector<8x64xf32>, vector<64x4xf32>, vector<8x4xf32> -> vector<8x4xf32>
    %c16 = arith.constant 16 : index
    %c0_79 = arith.constant 0 : index
    %88 = vector.load %arg2[%c16, %c0_79] : memref<56x128xf32, #tpu.memory_space<vmem>>, vector<1x4xf32>
    %89 = vector.broadcast %88 : vector<1x4xf32> to vector<8x4xf32>
    %90 = arith.addf %87, %89 : vector<8x4xf32>
    %c0_80 = arith.constant 0 : index
    %c0_81 = arith.constant 0 : index
    %91 = vector.load %arg3[%c0_80, %c0_81] : memref<8x4xf32, #tpu.memory_space<vmem>>, vector<8x4xf32>
    tpu.vector_store %arg3[%c0_80, %c0_81], %90 {strides = array<i32>} : memref<8x4xf32, #tpu.memory_space<vmem>>, vector<8x4xf32>,
    %cst_82 = arith.constant 0.000000e+00 : f32
    %92 = vector.broadcast %cst_82 : f32 to vector<8x32xf32>
    %c0_83 = arith.constant 0 : index
    %c0_84 = arith.constant 0 : index
    %c0_85 = arith.constant 0 : index
    %93 = tpu.strided_load %arg6[%c0_83, %c0_84, %c0_85] {strides = array<i32: 1, 2, 1>} : memref<2x10x40xf32, #tpu.memory_space<vmem>>, vector<2x4x40xf32>
    %94 = vector.shape_cast %93 : vector<2x4x40xf32> to vector<8x40xf32>
    %c744 = arith.constant 744 : index
    %c0_86 = arith.constant 0 : index
    %95 = vector.load %arg1[%c744, %c0_86] : memref<1128x128xf32, #tpu.memory_space<vmem>>, vector<40x32xf32>
    %cst_87 = arith.constant dense<0.000000e+00> : vector<8x32xf32>
    %96 = tpu.matmul %94, %95, %cst_87 {dimension_numbers = #tpu.dot_dimension_numbers<[1], [0], [0], [1], [0, 0, 1, 1], [], []>} : vector<8x40xf32>, vector<40x32xf32>, vector<8x32xf32> -> vector<8x32xf32>
    %97 = arith.addf %92, %96 : vector<8x32xf32>
    %c0_88 = arith.constant 0 : index
    %c1_89 = arith.constant 1 : index
    %c0_90 = arith.constant 0 : index
    %98 = tpu.strided_load %arg6[%c0_88, %c1_89, %c0_90] {strides = array<i32: 1, 2, 1>} : memref<2x10x40xf32, #tpu.memory_space<vmem>>, vector<2x4x40xf32>
    %99 = vector.shape_cast %98 : vector<2x4x40xf32> to vector<8x40xf32>
    %c784 = arith.constant 784 : index
    %c0_91 = arith.constant 0 : index
    %100 = vector.load %arg1[%c784, %c0_91] : memref<1128x128xf32, #tpu.memory_space<vmem>>, vector<40x32xf32>
    %cst_92 = arith.constant dense<0.000000e+00> : vector<8x32xf32>
    %101 = tpu.matmul %99, %100, %cst_92 {dimension_numbers = #tpu.dot_dimension_numbers<[1], [0], [0], [1], [0, 0, 1, 1], [], []>} : vector<8x40xf32>, vector<40x32xf32>, vector<8x32xf32> -> vector<8x32xf32>
    %102 = arith.addf %97, %101 : vector<8x32xf32>
    %c0_93 = arith.constant 0 : index
    %c2_94 = arith.constant 2 : index
    %c0_95 = arith.constant 0 : index
    %103 = tpu.strided_load %arg6[%c0_93, %c2_94, %c0_95] {strides = array<i32: 1, 2, 1>} : memref<2x10x40xf32, #tpu.memory_space<vmem>>, vector<2x4x40xf32>
    %104 = vector.shape_cast %103 : vector<2x4x40xf32> to vector<8x40xf32>
    %c824 = arith.constant 824 : index
    %c0_96 = arith.constant 0 : index
    %105 = vector.load %arg1[%c824, %c0_96] : memref<1128x128xf32, #tpu.memory_space<vmem>>, vector<40x32xf32>
    %cst_97 = arith.constant dense<0.000000e+00> : vector<8x32xf32>
    %106 = tpu.matmul %104, %105, %cst_97 {dimension_numbers = #tpu.dot_dimension_numbers<[1], [0], [0], [1], [0, 0, 1, 1], [], []>} : vector<8x40xf32>, vector<40x32xf32>, vector<8x32xf32> -> vector<8x32xf32>
    %107 = arith.addf %102, %106 : vector<8x32xf32>
    %c0_98 = arith.constant 0 : index
    %c3_99 = arith.constant 3 : index
    %c0_100 = arith.constant 0 : index
    %108 = tpu.strided_load %arg6[%c0_98, %c3_99, %c0_100] {strides = array<i32: 1, 2, 1>} : memref<2x10x40xf32, #tpu.memory_space<vmem>>, vector<2x4x40xf32>
    %109 = vector.shape_cast %108 : vector<2x4x40xf32> to vector<8x40xf32>
    %c864 = arith.constant 864 : index
    %c0_101 = arith.constant 0 : index
    %110 = vector.load %arg1[%c864, %c0_101] : memref<1128x128xf32, #tpu.memory_space<vmem>>, vector<40x32xf32>
    %cst_102 = arith.constant dense<0.000000e+00> : vector<8x32xf32>
    %111 = tpu.matmul %109, %110, %cst_102 {dimension_numbers = #tpu.dot_dimension_numbers<[1], [0], [0], [1], [0, 0, 1, 1], [], []>} : vector<8x40xf32>, vector<40x32xf32>, vector<8x32xf32> -> vector<8x32xf32>
    %112 = arith.addf %107, %111 : vector<8x32xf32>
    %c32 = arith.constant 32 : index
    %c0_103 = arith.constant 0 : index
    %113 = vector.load %arg2[%c32, %c0_103] : memref<56x128xf32, #tpu.memory_space<vmem>>, vector<1x32xf32>
    %114 = vector.broadcast %113 : vector<1x32xf32> to vector<8x32xf32>
    %115 = arith.addf %112, %114 : vector<8x32xf32>
    %cst_104 = arith.constant 0.000000e+00 : f32
    %116 = vector.broadcast %cst_104 : f32 to vector<8x32xf32>
    %117 = arith.cmpf oge, %115, %116 : vector<8x32xf32>
    %cst_105 = arith.constant 2.000000e-01 : f32
    %118 = vector.broadcast %cst_105 : f32 to vector<8x32xf32>
    %119 = arith.mulf %118, %115 : vector<8x32xf32>
    %120 = arith.select %117, %115, %119 : vector<8x32xi1>, vector<8x32xf32>
    %121 = vector.shape_cast %120 : vector<8x32xf32> to vector<2x4x32xf32>
    %c0_106 = arith.constant 0 : index
    %c1_107 = arith.constant 1 : index
    %c8_108 = arith.constant 8 : index
    %122 = vector.load %arg7[%c0_106, %c1_107, %c8_108] : memref<2x6x48xf32, #tpu.memory_space<vmem>>, vector<2x4x32xf32>
    tpu.vector_store %arg7[%c0_106, %c1_107, %c8_108], %121 {strides = array<i32>} : memref<2x6x48xf32, #tpu.memory_space<vmem>>, vector<2x4x32xf32>,
    %cst_109 = arith.constant 0.000000e+00 : f32
    %123 = vector.broadcast %cst_109 : f32 to vector<4x32xf32>
    %c0_110 = arith.constant 0 : index
    %c0_111 = arith.constant 0 : index
    %c0_112 = arith.constant 0 : index
    %124 = tpu.strided_load %arg7[%c0_110, %c0_111, %c0_112] {strides = array<i32: 1, 2, 1>} : memref<2x6x48xf32, #tpu.memory_space<vmem>>, vector<2x2x48xf32>
    %125 = vector.shape_cast %124 : vector<2x2x48xf32> to vector<4x48xf32>
    %c904 = arith.constant 904 : index
    %c0_113 = arith.constant 0 : index
    %126 = vector.load %arg1[%c904, %c0_113] : memref<1128x128xf32, #tpu.memory_space<vmem>>, vector<48x32xf32>
    %cst_114 = arith.constant dense<0.000000e+00> : vector<4x32xf32>
    %127 = tpu.matmul %125, %126, %cst_114 {dimension_numbers = #tpu.dot_dimension_numbers<[1], [0], [0], [1], [0, 0, 1, 1], [], []>} : vector<4x48xf32>, vector<48x32xf32>, vector<4x32xf32> -> vector<4x32xf32>
    %128 = arith.addf %123, %127 : vector<4x32xf32>
    %c0_115 = arith.constant 0 : index
    %c1_116 = arith.constant 1 : index
    %c0_117 = arith.constant 0 : index
    %129 = tpu.strided_load %arg7[%c0_115, %c1_116, %c0_117] {strides = array<i32: 1, 2, 1>} : memref<2x6x48xf32, #tpu.memory_space<vmem>>, vector<2x2x48xf32>
    %130 = vector.shape_cast %129 : vector<2x2x48xf32> to vector<4x48xf32>
    %c952 = arith.constant 952 : index
    %c0_118 = arith.constant 0 : index
    %131 = vector.load %arg1[%c952, %c0_118] : memref<1128x128xf32, #tpu.memory_space<vmem>>, vector<48x32xf32>
    %cst_119 = arith.constant dense<0.000000e+00> : vector<4x32xf32>
    %132 = tpu.matmul %130, %131, %cst_119 {dimension_numbers = #tpu.dot_dimension_numbers<[1], [0], [0], [1], [0, 0, 1, 1], [], []>} : vector<4x48xf32>, vector<48x32xf32>, vector<4x32xf32> -> vector<4x32xf32>
    %133 = arith.addf %128, %132 : vector<4x32xf32>
    %c0_120 = arith.constant 0 : index
    %c2_121 = arith.constant 2 : index
    %c0_122 = arith.constant 0 : index
    %134 = tpu.strided_load %arg7[%c0_120, %c2_121, %c0_122] {strides = array<i32: 1, 2, 1>} : memref<2x6x48xf32, #tpu.memory_space<vmem>>, vector<2x2x48xf32>
    %135 = vector.shape_cast %134 : vector<2x2x48xf32> to vector<4x48xf32>
    %c1000 = arith.constant 1000 : index
    %c0_123 = arith.constant 0 : index
    %136 = vector.load %arg1[%c1000, %c0_123] : memref<1128x128xf32, #tpu.memory_space<vmem>>, vector<48x32xf32>
    %cst_124 = arith.constant dense<0.000000e+00> : vector<4x32xf32>
    %137 = tpu.matmul %135, %136, %cst_124 {dimension_numbers = #tpu.dot_dimension_numbers<[1], [0], [0], [1], [0, 0, 1, 1], [], []>} : vector<4x48xf32>, vector<48x32xf32>, vector<4x32xf32> -> vector<4x32xf32>
    %138 = arith.addf %133, %137 : vector<4x32xf32>
    %c0_125 = arith.constant 0 : index
    %c3_126 = arith.constant 3 : index
    %c0_127 = arith.constant 0 : index
    %139 = tpu.strided_load %arg7[%c0_125, %c3_126, %c0_127] {strides = array<i32: 1, 2, 1>} : memref<2x6x48xf32, #tpu.memory_space<vmem>>, vector<2x2x48xf32>
    %140 = vector.shape_cast %139 : vector<2x2x48xf32> to vector<4x48xf32>
    %c1048 = arith.constant 1048 : index
    %c0_128 = arith.constant 0 : index
    %141 = vector.load %arg1[%c1048, %c0_128] : memref<1128x128xf32, #tpu.memory_space<vmem>>, vector<48x32xf32>
    %cst_129 = arith.constant dense<0.000000e+00> : vector<4x32xf32>
    %142 = tpu.matmul %140, %141, %cst_129 {dimension_numbers = #tpu.dot_dimension_numbers<[1], [0], [0], [1], [0, 0, 1, 1], [], []>} : vector<4x48xf32>, vector<48x32xf32>, vector<4x32xf32> -> vector<4x32xf32>
    %143 = arith.addf %138, %142 : vector<4x32xf32>
    %c40 = arith.constant 40 : index
    %c0_130 = arith.constant 0 : index
    %144 = vector.load %arg2[%c40, %c0_130] : memref<56x128xf32, #tpu.memory_space<vmem>>, vector<1x32xf32>
    %145 = vector.broadcast %144 : vector<1x32xf32> to vector<4x32xf32>
    %146 = arith.addf %143, %145 : vector<4x32xf32>
    %cst_131 = arith.constant 0.000000e+00 : f32
    %147 = vector.broadcast %cst_131 : f32 to vector<4x32xf32>
    %148 = arith.cmpf oge, %146, %147 : vector<4x32xf32>
    %cst_132 = arith.constant 2.000000e-01 : f32
    %149 = vector.broadcast %cst_132 : f32 to vector<4x32xf32>
    %150 = arith.mulf %149, %146 : vector<4x32xf32>
    %151 = arith.select %148, %146, %150 : vector<4x32xi1>, vector<4x32xf32>
    %c1096 = arith.constant 1096 : index
    %c0_133 = arith.constant 0 : index
    %152 = vector.load %arg1[%c1096, %c0_133] : memref<1128x128xf32, #tpu.memory_space<vmem>>, vector<32x2xf32>
    %cst_134 = arith.constant dense<0.000000e+00> : vector<4x2xf32>
    %153 = tpu.matmul %151, %152, %cst_134 {dimension_numbers = #tpu.dot_dimension_numbers<[1], [0], [0], [1], [0, 0, 1, 1], [], []>} : vector<4x32xf32>, vector<32x2xf32>, vector<4x2xf32> -> vector<4x2xf32>
    %c48 = arith.constant 48 : index
    %c0_135 = arith.constant 0 : index
    %154 = vector.load %arg2[%c48, %c0_135] : memref<56x128xf32, #tpu.memory_space<vmem>>, vector<1x2xf32>
    %155 = vector.broadcast %154 : vector<1x2xf32> to vector<4x2xf32>
    %156 = arith.addf %153, %155 : vector<4x2xf32>
    %c0_136 = arith.constant 0 : index
    %c0_137 = arith.constant 0 : index
    %157 = vector.load %arg4[%c0_136, %c0_137] : memref<4x2xf32, #tpu.memory_space<vmem>>, vector<4x2xf32>
    tpu.vector_store %arg4[%c0_136, %c0_137], %156 {strides = array<i32>} : memref<4x2xf32, #tpu.memory_space<vmem>>, vector<4x2xf32>,
    return
  }
}

</mosaic_0001>

<bundles_post_ra>
// kernel: tile.18
= control target key start
LH: loop header
LB: loop body
LE: loop exit
PB: predicated region body
PF: predicated region fallthrough
CT: control target
= control target key end

     0   :  { %s22_s0 = inlined_call_operand.vmem [shape: f32[8], index: 0, kind: input, shape index: {}]   ;;  %s23_s1 = inlined_call_operand.vmem [shape: f32[8,8], index: 1, kind: output, shape index: {}]  }
   0x1   :  { %v4_v0 = vld [vmem:[%s22_s0] ss:$0 sm:$0xff] }
   0x2   :  { %5 = vst [vmem:[%s23_s1] sm:$0xff] %v4_v0 }

// kernel: tile.26
= control target key start
LH: loop header
LB: loop body
LE: loop exit
PB: predicated region body
PF: predicated region fallthrough
CT: control target
= control target key end

     0   :  { %s22_s0 = inlined_call_operand.vmem [shape: f32[8], index: 0, kind: input, shape index: {}]   ;;  %s23_s1 = inlined_call_operand.vmem [shape: f32[4,8], index: 1, kind: output, shape index: {}]  }
   0x1   :  { %v4_v0 = vld [vmem:[%s22_s0] ss:$0 sm:$0xff] }
   0x2   :  { %5 = vst [vmem:[%s23_s1] sm:$0xf] %v4_v0 }

// kernel: _lambda_.1
= control target key start
LH: loop header
LB: loop body
LE: loop exit
PB: predicated region body
PF: predicated region fallthrough
CT: control target
= control target key end

     0   :  { %10 = vsyncpa [#allocation6], 0  ;;  %vm49_vm0 = vcmask 588800   ;;  %s1623_s0 = inlined_call_operand.vmem [shape: f32[2,18,72], index: 0, kind: input, shape index: {}]   ;;  %s1624_s1 = inlined_call_operand.vmem [shape: f32[1128,128], index: 1, kind: input, shape index: {}]   ;;  %s1625_s2 = inlined_call_operand.vmem [shape: f32[56,128], index: 2, kind: input, shape index: {}]   ;;  %s1626_s3 = inlined_call_operand.hbm [shape: f32[8,4], index: 3, kind: output, shape index: {0}]   ;;  %s1627_s4 = inlined_call_operand.hbm [shape: f32[4,2], index: 4, kind: output, shape index: {1}]  }
   0x1   :  { %v41_v0 = vld [vmem:[%s1624_s1 + $0x2e0] sm:$0xff]  ;;  %v40_v1 = vld [vmem:[%s1624_s1 + $0x2d8] sm:$0xff]  ;;  %v39_v2 = vld [vmem:[%s1624_s1 + $0x2d0] sm:$0xff] }
   0x2   :  { %125 = vmatpush.msra.mxu2 %v41_v0  ;;  %63 = vmatpush.msra.mxu0 %v41_v0  ;;  %v178_v3 = vld [vmem:[%s1624_s1 + $0x88] sm:$0xff]  ;;  %v177_v4 = vld [vmem:[%s1624_s1 + $0x80] sm:$0xff]  ;;  %v176_v6 = vld [vmem:[%s1624_s1 + $0x78] sm:$0xff] }
   0x3   :  { %92 = vmatpush.msra.mxu1 %v41_v0  ;;  %v38_v5 = vld [vmem:[%s1624_s1 + $0x2c8] sm:$0xff]  ;;  %192 = vmatpush.msra.mxu3 %v178_v3  ;;  %v37_v7 = vld [vmem:[%s1624_s1 + $0x2c0] sm:$0xff]  ;;  %v175_v8 = vld [vmem:[%s1624_s1 + $0x70] sm:$0xff] }
   0x4   :  { %126 = vmatpush.msra.mxu2 %v40_v1  ;;  %64 = vmatpush.msra.mxu0 %v40_v1  ;;  %v36_v9 = vld [vmem:[%s1624_s1 + $0x2b8] sm:$0xff]  ;;  %v174_v10 = vld [vmem:[%s1624_s1 + $0x68] sm:$0xff]  ;;  %v35_v11 = vld [vmem:[%s1624_s1 + $0x2b0] sm:$0xff] }
   0x5   :  { %93 = vmatpush.msra.mxu1 %v40_v1  ;;  %193 = vmatpush.msra.mxu3 %v177_v4  ;;  %v173_v12 = vld [vmem:[%s1624_s1 + $0x60] sm:$0xff]  ;;  %v34_v13 = vld [vmem:[%s1624_s1 + $0x2a8] sm:$0xff]  ;;  %v172_v14 = vld [vmem:[%s1624_s1 + $0x58] sm:$0xff] }
   0x6   :  { %127 = vmatpush.msra.mxu2 %v39_v2  ;;  %65 = vmatpush.msra.mxu0 %v39_v2  ;;  %v33_v15 = vld [vmem:[%s1624_s1 + $0x2a0] sm:$0xff]  ;;  %v291_v17 = vld [vmem:[%s1624_s1 + $0x118] sm:$0xff]  ;;  %v290_v19 = vld [vmem:[%s1624_s1 + $0x110] sm:$0xff] }
   0x7   :  { %94 = vmatpush.msra.mxu1 %v39_v2  ;;  %194 = vmatpush.msra.mxu3 %v176_v6  ;;  %v957_v16 = vld [vmem:[%s1623_s0 + $0x2] ss:$2 sm:$0xff]  ;;  %v951_v20 = vld [vmem:[%s1623_s0 + $0x1] ss:$2 sm:$0xff]  ;;  %v166_v22 = vld [vmem:[%s1624_s1 + $0x38] sm:$0xff] }
   0x8   :  { %128 = vmatpush.msra.mxu2 %v38_v5  ;;  %66 = vmatpush.msra.mxu0 %v38_v5  ;;  %v167_v18 = vld [vmem:[%s1624_s1 + $0x40] sm:$0xff]  ;;  %v247_v23 = vld [vmem:[%s1624_s1 + $0xd0] sm:$0xff]  ;;  %v289_v24 = vld [vmem:[%s1624_s1 + $0x108] sm:$0xff] }
   0x9   :  { %95 = vmatpush.msra.mxu1 %v38_v5  ;;  %195 = vmatpush.msra.mxu3 %v175_v8  ;;  %v42_v21 = vld [vmem:[%s1623_s0] ss:$2 sm:$0xff]  ;;  %v165_v25 = vld [vmem:[%s1624_s1 + $0x30] sm:$0xff] }
   0xa   :  { %129 = vmatpush.msra.mxu2 %v37_v7  ;;  %67 = vmatpush.msra.mxu0 %v37_v7  ;;  %v246_v26 = vld [vmem:[%s1624_s1 + $0xc8] sm:$0xff]  ;;  %v171_v27 = vld [vmem:[%s1624_s1 + $0x50] sm:$0xff] }
   0xb   :  { %96 = vmatpush.msra.mxu1 %v37_v7  ;;  %196 = vmatpush.msra.mxu3 %v174_v10  ;;  %v170_v28 = vld [vmem:[%s1624_s1 + $0x48] sm:$0xff] }
   0xc   :  { %130 = vmatpush.msra.mxu2 %v36_v9  ;;  %68 = vmatpush.msra.mxu0 %v36_v9 }
   0xd   :  { %97 = vmatpush.msra.mxu1 %v36_v9  ;;  %197 = vmatpush.msra.mxu3 %v173_v12 }
   0xe   :  { %131 = vmatpush.msra.mxu2 %v35_v11  ;;  %69 = vmatpush.msra.mxu0 %v35_v11 }
   0xf   :  { %98 = vmatpush.msra.mxu1 %v35_v11  ;;  %198 = vmatpush.msra.mxu3 %v172_v14 }
  0x10   :  { %132 = vmatpush.msra.mxu2 %v34_v13  ;;  %70 = vmatpush.msra.mxu0 %v34_v13 }
  0x11   :  { %99 = vmatpush.msra.mxu1 %v34_v13 }
  0x12   :  { %133 = vmatpush.msra.mxu2 %v33_v15  ;;  %71 = vmatpush.msra.mxu0 %v33_v15 }
  0x13   :  { %959 = vmatmul.msk.f32.vlgmr.msra.gmra.mxu2 %vm49_vm0, %v957_v16  ;;  %100 = vmatpush.msra.mxu1 %v33_v15 }
  0x14   :  { %305 = vmatpush.msrb.mxu2 %v291_v17  ;;  %221 = vmatpush.msrb.mxu0 %v167_v18 }
  0x15   :  { %953 = vmatmul.msk.f32.vlgmr.msra.gmra.mxu0 %vm49_vm0, %v951_v20  ;;  %955 = vmatmul.msk.f32.vlgmr.msra.gmra.mxu1 %vm49_vm0, %v42_v21 }
  0x16   :  { %306 = vmatpush.msrb.mxu2 %v290_v19  ;;  %222 = vmatpush.msrb.mxu0 %v166_v22 }
  0x17   :  { %11 = vsyncpa [#allocation8], 0  ;;  %261 = vmatpush.msrb.mxu1 %v247_v23  ;;  %v288_v29 = vld [vmem:[%s1624_s1 + $0x100] sm:$0xff]  ;;  %v164_v30 = vld [vmem:[%s1624_s1 + $0x28] sm:$0xff]  ;;  %199 = vmatpush.msra.mxu3 %v171_v27  ;;  %s1053_s5 = smov 4   ;;  %s1054_s7 = smov 8  }
  0x18   :  { %307 = vmatpush.msrb.mxu2 %v289_v24  ;;  %223 = vmatpush.msrb.mxu0 %v165_v25  ;;  %v958_v31 = vld [vmem:[%s1623_s0 + $0x1a] ss:$2 sm:$0xff]  ;;  %v952_v36 = vld [vmem:[%s1623_s0 + $0x19] ss:$2 sm:$0xff]  ;;  %v286_v37 = vld [vmem:[%s1624_s1 + $0xf0] sm:$0xff]  ;;  %vm24_vm3 = vcmask 326656  }
  0x19   :  { %v245_v32 = vld [vmem:[%s1624_s1 + $0xc0] sm:$0xff]  ;;  %262 = vmatpush.msrb.mxu1 %v246_v26  ;;  %v287_v33 = vld [vmem:[%s1624_s1 + $0xf8] sm:$0xff]  ;;  %200 = vmatpush.msra.mxu3 %v170_v28  ;;  %v243_v40 = vld [vmem:[%s1624_s1 + $0xb0] sm:$0xff]  ;;  %vm26_vm4 = vcmask 320512   ;;  %vm18_vm5 = vcmask 654336   ;;  %vm20_vm6 = vcmask 648192  }
  0x1a   :  { %v163_v34 = vld [vmem:[%s1624_s1 + $0x20] sm:$0xff]  ;;  %308 = vmatpush.msrb.mxu2 %v288_v29  ;;  %224 = vmatpush.msrb.mxu0 %v164_v30  ;;  %v244_v35 = vld [vmem:[%s1624_s1 + $0xb8] sm:$0xff]  ;;  %v285_v41 = vld [vmem:[%s1624_s1 + $0xe8] sm:$0xff]  ;;  %v1055_v29 = vmov 0.0   ;;  %vm154_vm7 = vcmask 293920   ;;  %vm341_vm8 = vcmask 588864  }
  0x1b   :  { %960 = vmatmul.msk.f32.gmra.mxu2 %vm49_vm0, %v958_v31  ;;  %263 = vmatpush.msrb.mxu1 %v245_v32  ;;  %v950_v38 = vld [vmem:[%s1623_s0 + $0x18] ss:$2 sm:$0xff]  ;;  %v962_v42 = vld [vmem:[%s1623_s0 + $0x1] ss:$2 sm:$0xff]  ;;  %v161_v43 = vld [vmem:[%s1624_s1 + $0x10] sm:$0xff]  ;;  %25 = vst.msk [vmem:[#allocation3] sm:$0xff] %vm24_vm3, %v1055_v29 }
  0x1c   :  { %309 = vmatpush.msrb.mxu2 %v287_v33  ;;  %225 = vmatpush.msrb.mxu0 %v163_v34  ;;  %v162_v39 = vld [vmem:[%s1624_s1 + $0x18] sm:$0xff]  ;;  %v242_v44 = vld [vmem:[%s1624_s1 + $0xa8] sm:$0xff]  ;;  %v284_v45 = vld [vmem:[%s1624_s1 + $0xe0] sm:$0xff]  ;;  %27 = vst.msk [vmem:[#allocation3 + $0x8] sm:$0x3] %vm26_vm4, %v1055_v29  ;;  %vm529_vm10 = vcmask 523264  }
  0x1d   :  { %264 = vmatpush.msrb.mxu1 %v244_v35  ;;  %954 = vmatmul.msk.f32.gmra.mxu0 %vm49_vm0, %v952_v36  ;;  %v160_v46 = vld [vmem:[%s1624_s1 + $0x8] sm:$0xff]  ;;  %v241_v47 = vld [vmem:[%s1624_s1 + $0xa0] sm:$0xff]  ;;  %v283_v48 = vld [vmem:[%s1624_s1 + $0xd8] sm:$0xff]  ;;  %28 = vst.msk [vmem:[#allocation3 + $0x10] sm:$0xff] %vm24_vm3, %v1055_v29  ;;  %vm553_vm11 = vcmask 31744   ;;  %vm30_vm12 = vcmask 390144  }
  0x1e   :  { %310 = vmatpush.msrb.mxu2 %v286_v37  ;;  %956 = vmatmul.msk.f32.gmra.mxu1 %vm49_vm0, %v950_v38  ;;  %v972_v49 = vld [vmem:[%s1623_s0 + $0x3] ss:$2 sm:$0xff]  ;;  %v240_v51 = vld [vmem:[%s1624_s1 + $0x98] sm:$0xff]  ;;  %v157_v52 = vld [vmem:[%s1623_s0] ss:$2 sm:$0xff]  ;;  %19 = vst.msk [vmem:[#allocation2] sm:$0xff] %vm18_vm5, %v1055_v29 }
  0x1f   :  { %226 = vmatpush.msrb.mxu0 %v162_v39  ;;  %265 = vmatpush.msrb.mxu1 %v243_v40  ;;  %v159_v50 = vld [vmem:[%s1624_s1] sm:$0xff]  ;;  %v239_v53 = vld [vmem:[%s1624_s1 + $0x90] sm:$0xff]  ;;  %v143_v63 = vld [vmem:[%s1625_s2 + $0x18] sm:$0xff]  ;;  %29 = vst.msk [vmem:[#allocation3 + $0x18] sm:$0x3] %vm26_vm4, %v1055_v29  ;;  %vm723_vm14 = vcmask 322624  }
  0x20   :  { %311 = vmatpush.msrb.mxu2 %v285_v41  ;;  %964 = vmatmul.msk.f32.vlgmr.msra.gmra.mxu3 %vm49_vm0, %v962_v42  ;;  %v963_v54 = vld [vmem:[%s1623_s0 + $0x19] ss:$2 sm:$0xff]  ;;  %v968_v55 = vld [vmem:[%s1623_s0 + $0x2] ss:$2 sm:$0xff]  ;;  %v995_v13 = vld [vmem:[%s1625_s2] ss:$0 sm:$0xff] }
  0x21   :  { %227 = vmatpush.msrb.mxu0 %v161_v43  ;;  %266 = vmatpush.msrb.mxu1 %v242_v44  ;;  %v973_v56 = vld [vmem:[%s1623_s0 + $0x1b] ss:$2 sm:$0xff]  ;;  %v961_v57 = vld [vmem:[%s1623_s0 + $0x18] ss:$2 sm:$0xff]  ;;  %21 = vst.msk [vmem:[#allocation2 + $0x8] sm:$0x3] %vm20_vm6, %v1055_v29 }
  0x22   :  { %312 = vmatpush.msrb.mxu2 %v284_v45  ;;  %v969_v58 = vld [vmem:[%s1623_s0 + $0x1a] ss:$2 sm:$0xff]  ;;  %22 = vst.msk [vmem:[#allocation2 + $0x10] sm:$0xff] %vm18_vm5, %v1055_v29  ;;  %v369_v31 = vld [vmem:[%s1624_s1 + $0x1b0] sm:$0xff]  ;;  %vm751_vm15 = vcmask 392192   ;;  %s1056_s24 = smov [#allocation5]  }
  0x23   :  { %228 = vmatpush.msrb.mxu0 %v160_v46  ;;  %267 = vmatpush.msrb.mxu1 %v241_v47  ;;  %23 = vst.msk [vmem:[#allocation2 + $0x18] sm:$0x3] %vm20_vm6, %v1055_v29  ;;  %v370_v30 = vld [vmem:[%s1624_s1 + $0x1b8] sm:$0xff]  ;;  %v368_v33 = vld [vmem:[%s1624_s1 + $0x1a8] sm:$0xff]  ;;  %v367_v34 = vld [vmem:[%s1624_s1 + $0x1a0] sm:$0xff]  ;;  %s925_s27 = sshll.u32 %s1626_s3, 4  ;;  %s926_s27 = int_to_ptr.hbm [resolvable:$true] %s925_s27 }
  0x24   :  { %313 = vmatpush.msrb.mxu2 %v283_v48  ;;  %385 = vmatpush.msrb.mxu3 %v370_v30  ;;  %v366_v36 = vld [vmem:[%s1624_s1 + $0x198] sm:$0xff]  ;;  %v356_v37 = vld [vmem:[%s1624_s1 + $0x168] sm:$0xff]  ;;  %v365_v38 = vld [vmem:[%s1624_s1 + $0x190] sm:$0xff]  ;;  %31 = vst.msk [vmem:[#allocation4] sm:$0x3f] %vm30_vm12, %v1055_v29  ;;  %s1057_s29 = smov [#allocation7]  }
  0x25   :  { %974 = vmatmul.msk.f32.vlgmr.msrb.gmra.mxu2 %vm49_vm0, %v972_v49  ;;  %229 = vmatpush.msrb.mxu0 %v159_v50  ;;  %v355_v39 = vld [vmem:[%s1624_s1 + $0x160] sm:$0xff]  ;;  %v364_v40 = vld [vmem:[%s1624_s1 + $0x188] sm:$0xff]  ;;  %v354_v41 = vld [vmem:[%s1624_s1 + $0x158] sm:$0xff]  ;;  %32 = vst.msk [vmem:[#allocation4 + $0x8] sm:$0x3f] %vm30_vm12, %v1055_v29  ;;  %s934_s30 = sshll.u32 %s1057_s29, 4  ;;  %s935_s30 = int_to_ptr.vmem [resolvable:$true] %s934_s30 }
  0x26   :  { %268 = vmatpush.msrb.mxu1 %v240_v51  ;;  %966 = vmatmul.msk.f32.vlgmr.msrb.gmra.mxu0 %vm49_vm0, %v157_v52  ;;  %v363_v42 = vld [vmem:[%s1624_s1 + $0x180] sm:$0xff]  ;;  %v353_v43 = vld [vmem:[%s1624_s1 + $0x150] sm:$0xff]  ;;  %v362_v44 = vld [vmem:[%s1624_s1 + $0x178] sm:$0xff]  ;;  %s936_s6 = sshll.u32 %s1627_s4, 4  ;;  %s937_s6 = int_to_ptr.hbm [resolvable:$true] %s936_s6 }
  0x27   :  { %386 = vmatpush.msrb.mxu3 %v369_v31  ;;  %413 = vmatpush.msra.mxu0 %v356_v37  ;;  %v352_v45 = vld [vmem:[%s1624_s1 + $0x148] sm:$0xff]  ;;  %v361_v47 = vld [vmem:[%s1624_s1 + $0x170] sm:$0xff]  ;;  %v351_v48 = vld [vmem:[%s1624_s1 + $0x140] sm:$0xff] }
  0x28   :  { %269 = vmatpush.msrb.mxu1 %v239_v53  ;;  %965 = vmatmul.msk.f32.gmra.mxu3 %vm49_vm0, %v963_v54  ;;  %v440_v46 = vld [vmem:[%s1624_s1 + $0x208] sm:$0xff]  ;;  %v439_v49 = vld [vmem:[%s1624_s1 + $0x200] sm:$0xff]  ;;  %v350_v50 = vld [vmem:[%s1624_s1 + $0x138] sm:$0xff] }
  0x29   :  { %970 = vmatmul.msk.f32.vlgmr.msrb.gmra.mxu1 %vm49_vm0, %v968_v55  ;;  %387 = vmatpush.msrb.mxu3 %v368_v33  ;;  %v438_v51 = vld [vmem:[%s1624_s1 + $0x1f8] sm:$0xff]  ;;  %v349_v53 = vld [vmem:[%s1624_s1 + $0x130] sm:$0xff]  ;;  %v348_v55 = vld [vmem:[%s1624_s1 + $0x128] sm:$0xff] }
  0x2a   :  { %414 = vmatpush.msra.mxu0 %v355_v39  ;;  %455 = vmatpush.msra.mxu1 %v440_v46  ;;  %v437_v54 = vld [vmem:[%s1624_s1 + $0x1f0] sm:$0xff]  ;;  %v673_v33 = vld [vmem:[%s1624_s1 + $0x378] sm:$0xff]  ;;  %v670_v39 = vld [vmem:[%s1624_s1 + $0x360] sm:$0xff] }
  0x2b   :  { %388 = vmatpush.msrb.mxu3 %v367_v34  ;;  %v672_v34 = vld [vmem:[%s1624_s1 + $0x370] sm:$0xff] }
  0x2c   :  { %415 = vmatpush.msra.mxu0 %v354_v41  ;;  %456 = vmatpush.msra.mxu1 %v439_v49 }
  0x2d   :  { %975 = vmatmul.msk.f32.gmra.mxu2 %vm49_vm0, %v973_v56  ;;  %389 = vmatpush.msrb.mxu3 %v366_v36  ;;  %v436_v56 = vld [vmem:[%s1624_s1 + $0x1e8] sm:$0xff] }
  0x2e   :  { %967 = vmatmul.msk.f32.gmra.mxu0 %vm49_vm0, %v961_v57  ;;  %457 = vmatpush.msra.mxu1 %v438_v51  ;;  %v483_v57 = vld [vmem:[%s1624_s1 + $0x258] sm:$0xff]  ;;  %v525_v51 = vld [vmem:[%s1624_s1 + $0x290] sm:$0xff] }
  0x2f   :  { %390 = vmatpush.msrb.mxu3 %v365_v38  ;;  %416 = vmatpush.msra.mxu0 %v353_v43 }
  0x30   :  { %458 = vmatpush.msra.mxu1 %v437_v54  ;;  %498 = vmatpush.msra.mxu2 %v483_v57  ;;  %v522_v54 = vld [vmem:[%s1624_s1 + $0x278] sm:$0xff]  ;;  %v519_v57 = vld [vmem:[%s1624_s1 + $0x260] sm:$0xff] }
  0x31   :  { %971 = vmatmul.msk.f32.gmra.mxu1 %vm49_vm0, %v969_v58  ;;  %391 = vmatpush.msrb.mxu3 %v364_v40  ;;  %v347_v58 = vld [vmem:[%s1624_s1 + $0x120] sm:$0xff] }
  0x32   :  { %417 = vmatpush.msra.mxu0 %v352_v45  ;;  %459 = vmatpush.msra.mxu1 %v436_v56  ;;  %v520_v56 = vld [vmem:[%s1624_s1 + $0x268] sm:$0xff] }
  0x33   :  { %392 = vmatpush.msrb.mxu3 %v363_v42 }
  0x34   :  { %418 = vmatpush.msra.mxu0 %v351_v48 }
  0x35   :  { %393 = vmatpush.msrb.mxu3 %v362_v44 }
  0x36   :  { %419 = vmatpush.msra.mxu0 %v350_v50  ;;  %v526_v50 = vld [vmem:[%s1624_s1 + $0x298] sm:$0xff] }
  0x37   :  { %394 = vmatpush.msrb.mxu3 %v361_v47 }
  0x38   :  { %420 = vmatpush.msra.mxu0 %v349_v53  ;;  %v523_v53 = vld [vmem:[%s1624_s1 + $0x280] sm:$0xff] }
  0x39   :  { %541 = vmatpush.msra.mxu3 %v526_v50  ;;  %v848_v50 = vld [vmem:[%s1624_s1 + $0x430] sm:$0xff] }
  0x3a   :  { %421 = vmatpush.msra.mxu0 %v348_v55  ;;  %v521_v55 = vld [vmem:[%s1624_s1 + $0x270] sm:$0xff] }
  0x3b   :  { %542 = vmatpush.msra.mxu3 %v525_v51  ;;  %v847_v51 = vld [vmem:[%s1624_s1 + $0x428] sm:$0xff] }
  0x3c   :  { %422 = vmatpush.msra.mxu0 %v347_v58  ;;  %v571_v58 = vld [vmem:[%s1624_s1 + $0x330] sm:$0xff] }
  0x92   :  { %v73_v59 = vpop.f32.mrf.mxu0  ;;  %v102_v60 = vpop.f32.mrf.mxu1 }
  0x93   :  { %v103_v61 = vadd.f32 %v102_v60, %v73_v59  ;;  %v435_v59 = vld [vmem:[%s1624_s1 + $0x1e0] sm:$0xff]  ;;  %v482_v60 = vld [vmem:[%s1624_s1 + $0x250] sm:$0xff] }
  0x94   :  { %499 = vmatpush.msra.mxu2 %v482_v60  ;;  %460 = vmatpush.msra.mxu1 %v435_v59  ;;  %v570_v59 = vld [vmem:[%s1624_s1 + $0x328] sm:$0xff]  ;;  %v569_v60 = vld [vmem:[%s1624_s1 + $0x320] sm:$0xff] }
  0x96   :  { %v135_v62 = vpop.f32.mrf.mxu2 }
  0x97   :  { %v141_v0 = vadd.f32 %v135_v62, %v103_v61  ;;  %v434_v61 = vld [vmem:[%s1624_s1 + $0x1d8] sm:$0xff]  ;;  %v481_v62 = vld [vmem:[%s1624_s1 + $0x248] sm:$0xff] }
  0x98   :  { %500 = vmatpush.msra.mxu2 %v481_v62  ;;  %461 = vmatpush.msra.mxu1 %v434_v61  ;;  %v568_v61 = vld [vmem:[%s1624_s1 + $0x318] sm:$0xff]  ;;  %v567_v62 = vld [vmem:[%s1624_s1 + $0x310] sm:$0xff] }
  0x99   :  { %v144_v1 = vmul.f32 %v143_v63, %v141_v0 }
  0x9a   :  { %v76_v2 = vpop.f32.mrf.mxu0 }
  0x9b   :  { %v105_v3 = vpop.f32.mrf.mxu1  ;;  %148 = vrot.lane.b32.xlu1 %v144_v1, %s1053_s5  ;;  %v433_v1 = vld [vmem:[%s1624_s1 + $0x1d0] sm:$0xff] }
  0x9c   :  { %v106_v4 = vadd.f32 %v105_v3, %v76_v2  ;;  %v480_v2 = vld [vmem:[%s1624_s1 + $0x240] sm:$0xff]  ;;  %462 = vmatpush.msra.mxu1 %v433_v1  ;;  %v432_v3 = vld [vmem:[%s1624_s1 + $0x1c8] sm:$0xff] }
  0x9d   :  { %501 = vmatpush.msra.mxu2 %v480_v2 }
  0x9e   :  { %v138_v5 = vpop.f32.mrf.mxu2  ;;  %463 = vmatpush.msra.mxu1 %v432_v3 }
  0x9f   :  { %v142_v6 = vadd.f32 %v138_v5, %v106_v4  ;;  %v479_v4 = vld [vmem:[%s1624_s1 + $0x238] sm:$0xff]  ;;  %v431_v5 = vld [vmem:[%s1624_s1 + $0x1c0] sm:$0xff] }
  0xa0   :  { %502 = vmatpush.msra.mxu2 %v479_v4  ;;  %464 = vmatpush.msra.mxu1 %v431_v5  ;;  %v996_v4 = vld [vmem:[%s1625_s2 + $0x8] ss:$0 sm:$0xff] }
  0xa1   :  { %v145_v7 = vmul.f32 %v143_v63, %v142_v6  ;;  %v478_v6 = vld [vmem:[%s1624_s1 + $0x230] sm:$0xff] }
  0xa2   :  { %503 = vmatpush.msra.mxu2 %v478_v6 }
  0xa3   :  { %v202_v8 = vpop.f32.mrf.mxu3  ;;  %v231_v9 = vpop.f32.mrf.mxu0  ;;  %150 = vrot.lane.b32.xlu1 %v145_v7, %s1053_s5  ;;  %v477_v7 = vld [vmem:[%s1624_s1 + $0x228] sm:$0xff] }
  0xa4   :  { %v232_v10 = vadd.f32 %v231_v9, %v202_v8  ;;  %504 = vmatpush.msra.mxu2 %v477_v7  ;;  %v476_v9 = vld [vmem:[%s1624_s1 + $0x220] sm:$0xff] }
  0xa6   :  { %v271_v11 = vpop.f32.mrf.mxu1  ;;  %505 = vmatpush.msra.mxu2 %v476_v9 }
  0xa7   :  { %v277_v12 = vadd.f32 %v271_v11, %v232_v10  ;;  %v475_v10 = vld [vmem:[%s1624_s1 + $0x218] sm:$0xff]  ;;  %v474_v11 = vld [vmem:[%s1624_s1 + $0x210] sm:$0xff] }
  0xa8   :  { %v315_v14 = vpop.f32.mrf.mxu2  ;;  %506 = vmatpush.msra.mxu2 %v475_v10  ;;  %v997_v10 = vld [vmem:[%s1625_s2 + $0x10] ss:$0 sm:$0xff] }
  0xa9   :  { %v321_v15 = vadd.f32 %v315_v14, %v277_v12 }
  0xaa   :  { %507 = vmatpush.msra.mxu2 %v474_v11 }
  0xab   :  { %v325_v16 = vadd.f32 %v995_v13, %v321_v15  ;;  %v205_v17 = vpop.f32.mrf.mxu3  ;;  %v234_v18 = vpop.f32.mrf.mxu0  ;;  %v562_v15 = vld [vmem:[%s1624_s1 + $0x308] sm:$0xff] }
  0xac   :  { %v235_v19 = vadd.f32 %v234_v18, %v205_v17  ;;  %619 = vmatpush.msrb.mxu0 %v562_v15  ;;  %v560_v17 = vld [vmem:[%s1624_s1 + $0x2f8] sm:$0xff] }
  0xad   :  { %vm327_vm1 = vcmp.ge.f32.partialorder %v325_v16, 0.0  ;;  %v329_v20 = vmul.f32 0.2, %v325_v16  ;;  %v636_v18 = vld [vmem:[%s1624_s1 + $0x358] sm:$0xff] }
  0xae   :  { %v274_v21 = vpop.f32.mrf.mxu1  ;;  %656 = vmatpush.msrb.mxu1 %v636_v18  ;;  %v998_v18 = vld [vmem:[%s1625_s2 + $0x20] ss:$0 sm:$0xff] }
  0xaf   :  { %v278_v22 = vadd.f32 %v274_v21, %v235_v19  ;;  %v331_v23 = vsel %vm327_vm1, %v325_v16, %v329_v20  ;;  %v561_v16 = vld [vmem:[%s1624_s1 + $0x300] sm:$0xff]  ;;  %v559_v19 = vld [vmem:[%s1624_s1 + $0x2f0] sm:$0xff]  ;;  %vm892_vm1 = vcmask 261120  }
  0xb0   :  { %v318_v24 = vpop.f32.mrf.mxu2  ;;  %335 = vrot.lane.b32.xlu0 %v331_v23, %s1054_s7  ;;  %620 = vmatpush.msrb.mxu0 %v561_v16  ;;  %v558_v23 = vld [vmem:[%s1624_s1 + $0x2e8] sm:$0xff] }
  0xb1   :  { %v322_v25 = vadd.f32 %v318_v24, %v278_v22  ;;  %v635_v24 = vld [vmem:[%s1624_s1 + $0x350] sm:$0xff] }
  0xb2   :  { %621 = vmatpush.msrb.mxu0 %v560_v17  ;;  %657 = vmatpush.msrb.mxu1 %v635_v24 }
  0xb3   :  { %v326_v26 = vadd.f32 %v995_v13, %v322_v25  ;;  %v634_v25 = vld [vmem:[%s1624_s1 + $0x348] sm:$0xff] }
  0xb4   :  { %622 = vmatpush.msrb.mxu0 %v559_v19  ;;  %658 = vmatpush.msrb.mxu1 %v634_v25 }
  0xb5   :  { %vm328_vm2 = vcmp.ge.f32.partialorder %v326_v26, 0.0  ;;  %v330_v27 = vmul.f32 0.2, %v326_v26 }
  0xb6   :  { %623 = vmatpush.msrb.mxu0 %v558_v23 }
  0xb7   :  { %v332_v28 = vsel %vm328_vm2, %v326_v26, %v330_v27  ;;  %v674_v26 = vld [vmem:[%s1624_s1 + $0x380] sm:$0xff]  ;;  %vm916_vm2 = vcmask 11264  }
  0xb8   :  { %337 = vrot.lane.b32.xlu0 %v332_v28, %s1054_s7  ;;  %v633_v27 = vld [vmem:[%s1624_s1 + $0x340] sm:$0xff]  ;;  %694 = vmatpush.msrb.mxu2 %v674_v26 }
  0xb9   :  { %659 = vmatpush.msrb.mxu1 %v633_v27  ;;  %v744_v26 = vld [vmem:[%s1624_s1 + $0x3e0] sm:$0xff]  ;;  %v743_v27 = vld [vmem:[%s1624_s1 + $0x3d8] sm:$0xff] }
  0xba   :  { %695 = vmatpush.msrb.mxu2 %v673_v33  ;;  %v740_v33 = vld [vmem:[%s1624_s1 + $0x3c0] sm:$0xff] }
  0xbc   :  { %696 = vmatpush.msrb.mxu2 %v672_v34  ;;  %v739_v34 = vld [vmem:[%s1624_s1 + $0x3b8] sm:$0xff] }
 0x10d   :  { %v149_v32 = vpop.permute.xlu1 %148 }
 0x10e   :  { %155 = vst.msk [vmem:[#allocation3 + $0x1] sm:$0xff] %vm154_vm7, %v149_v32  ;;  %v632_v32 = vld [vmem:[%s1624_s1 + $0x338] sm:$0xff] }
 0x10f   :  { %660 = vmatpush.msrb.mxu1 %v632_v32  ;;  %v733_v32 = vld [vmem:[%s1624_s1 + $0x3a8] sm:$0xff] }
 0x115   :  { %v151_v35 = vpop.permute.xlu1 %150  ;;  %v564_v36 = vld [vmem:[#allocation3 + $0x1] ss:$2 sm:$0xf]  ;;  %v555_v42 = vld [vmem:[#allocation3] ss:$2 sm:$0xf] }
 0x116   :  { %156 = vst.msk [vmem:[#allocation3 + $0x11] sm:$0xff] %vm154_vm7, %v151_v35  ;;  %v671_v35 = vld [vmem:[%s1624_s1 + $0x368] sm:$0xff] }
 0x117   :  { %697 = vmatpush.msrb.mxu2 %v671_v35  ;;  %v629_v43 = vld [vmem:[#allocation3 + $0x2] ss:$2 sm:$0xf]  ;;  %v667_v46 = vld [vmem:[#allocation3 + $0x3] ss:$2 sm:$0xf] }
 0x118   :  { %v732_v35 = vld [vmem:[%s1624_s1 + $0x3a0] sm:$0xff] }
 0x119   :  { %698 = vmatpush.msrb.mxu2 %v670_v39  ;;  %v730_v39 = vld [vmem:[%s1624_s1 + $0x390] sm:$0xff] }
 0x11d   :  { %v566_v38 = vld [vmem:[#allocation3 + $0x11] ss:$2 sm:$0xf]  ;;  %v557_v40 = vld [vmem:[#allocation3 + $0x10] ss:$2 sm:$0xf] }
 0x11e   :  { %v631_v45 = vld [vmem:[#allocation3 + $0x12] ss:$2 sm:$0xf]  ;;  %v669_v48 = vld [vmem:[#allocation3 + $0x13] ss:$2 sm:$0xf] }
 0x122   :  { %v336_v52 = vpop.permute.xlu0 %335 }
 0x123   :  { %342 = vst.msk [vmem:[#allocation2 + $0x1] sm:$0xff] %vm341_vm8, %v336_v52  ;;  %v524_v52 = vld [vmem:[%s1624_s1 + $0x288] sm:$0xff] }
 0x124   :  { %543 = vmatpush.msra.mxu3 %v524_v52  ;;  %v846_v52 = vld [vmem:[%s1624_s1 + $0x420] sm:$0xff] }
 0x126   :  { %544 = vmatpush.msra.mxu3 %v523_v53 }
 0x128   :  { %545 = vmatpush.msra.mxu3 %v522_v54  ;;  %v845_v54 = vld [vmem:[%s1624_s1 + $0x418] sm:$0xff] }
 0x12a   :  { %v358_v63 = vld [vmem:[#allocation2 + $0x1] ss:$2 sm:$0xf]  ;;  %v338_v0 = vpop.permute.xlu0 %337  ;;  %v344_v12 = vld [vmem:[#allocation2] ss:$2 sm:$0xf]  ;;  %546 = vmatpush.msra.mxu3 %v521_v55 }
 0x12b   :  { %373 = vst [vmem:[#allocation1] ss:$2 sm:$0xff] %v358_v63  ;;  %v428_v20 = vld [vmem:[#allocation2 + $0x2] ss:$2 sm:$0xf] }
 0x12c   :  { %343 = vst.msk [vmem:[#allocation2 + $0x11] sm:$0xff] %vm341_vm8, %v338_v0  ;;  %v471_v28 = vld [vmem:[#allocation2 + $0x3] ss:$2 sm:$0xf]  ;;  %547 = vmatpush.msra.mxu3 %v520_v56 }
 0x12e   :  { %548 = vmatpush.msra.mxu3 %v519_v57 }
 0x133   :  { %v360_v8 = vld [vmem:[#allocation2 + $0x11] ss:$2 sm:$0xf]  ;;  %v346_v14 = vld [vmem:[#allocation2 + $0x10] ss:$2 sm:$0xf] }
 0x134   :  { %375 = vst [vmem:[#allocation1 + $0x1] ss:$2 sm:$0xff] %v360_v8  ;;  %v430_v22 = vld [vmem:[#allocation2 + $0x12] ss:$2 sm:$0xf] }
 0x135   :  { %v473_v31 = vld [vmem:[#allocation2 + $0x13] ss:$2 sm:$0xf] }
 0x13b   :  { %v376_v13 = vld.sshfl [vmem:[#allocation1] sm:$0xff pattern:$0x75316420] }
 0x13c   :  { %401 = vst [vmem:[#allocation1] ss:$2 sm:$0xff] %v344_v12  ;;  %976 = vmatmul.msk.f32.vlgmr.msrb.gmra.mxu3 %vm18_vm5, %v376_v13 }
 0x13d   :  { %403 = vst [vmem:[#allocation1 + $0x1] ss:$2 sm:$0xff] %v346_v14  ;;  %591 = vmatpush.msrb.mxu3 %v571_v58 }
 0x13f   :  { %592 = vmatpush.msrb.mxu3 %v570_v59 }
 0x141   :  { %593 = vmatpush.msrb.mxu3 %v569_v60 }
 0x143   :  { %594 = vmatpush.msrb.mxu3 %v568_v61 }
 0x144   :  { %v404_v21 = vld.sshfl [vmem:[#allocation1] sm:$0xff pattern:$0x75316420] }
 0x145   :  { %443 = vst [vmem:[#allocation1] ss:$2 sm:$0xff] %v428_v20  ;;  %977 = vmatmul.msk.f32.vlgmr.msra.gmra.mxu0 %vm18_vm5, %v404_v21  ;;  %595 = vmatpush.msrb.mxu3 %v567_v62 }
 0x146   :  { %445 = vst [vmem:[#allocation1 + $0x1] ss:$2 sm:$0xff] %v430_v22 }
 0x14d   :  { %v446_v30 = vld.sshfl [vmem:[#allocation1] sm:$0xff pattern:$0x75316420] }
 0x14e   :  { %486 = vst [vmem:[#allocation1] ss:$2 sm:$0xff] %v471_v28  ;;  %978 = vmatmul.msk.f32.vlgmr.msra.gmra.mxu1 %vm18_vm5, %v446_v30  ;;  %v742_v28 = vld [vmem:[%s1624_s1 + $0x3d0] sm:$0xff]  ;;  %v741_v30 = vld [vmem:[%s1624_s1 + $0x3c8] sm:$0xff] }
 0x14f   :  { %488 = vst [vmem:[#allocation1 + $0x1] ss:$2 sm:$0xff] %v473_v31  ;;  %v734_v31 = vld [vmem:[%s1624_s1 + $0x3b0] sm:$0xff] }
 0x150   :  { %792 = vmatpush.msra.mxu0 %v734_v31 }
 0x152   :  { %793 = vmatpush.msra.mxu0 %v733_v32 }
 0x154   :  { %794 = vmatpush.msra.mxu0 %v732_v35 }
 0x156   :  { %v489_v37 = vld.sshfl [vmem:[#allocation1] sm:$0xff pattern:$0x75316420] }
 0x157   :  { %574 = vst [vmem:[#allocation1] ss:$2 sm:$0xff] %v564_v36  ;;  %979 = vmatmul.msk.f32.vlgmr.msra.gmra.mxu2 %vm18_vm5, %v489_v37  ;;  %v731_v36 = vld [vmem:[%s1624_s1 + $0x398] sm:$0xff]  ;;  %v811_v37 = vld [vmem:[%s1624_s1 + $0x410] sm:$0xff] }
 0x158   :  { %576 = vst [vmem:[#allocation1 + $0x1] ss:$2 sm:$0xff] %v566_v38  ;;  %v810_v38 = vld [vmem:[%s1624_s1 + $0x408] sm:$0xff]  ;;  %830 = vmatpush.msra.mxu1 %v811_v37  ;;  %795 = vmatpush.msra.mxu0 %v731_v36 }
 0x15a   :  { %831 = vmatpush.msra.mxu1 %v810_v38  ;;  %796 = vmatpush.msra.mxu0 %v730_v39 }
 0x15f   :  { %v577_v41 = vld.sshfl [vmem:[#allocation1] sm:$0xff pattern:$0x75316420] }
 0x160   :  { %604 = vst [vmem:[#allocation1 + $0x1] ss:$2 sm:$0xff] %v557_v40 }
 0x161   :  { %602 = vst [vmem:[#allocation1] ss:$2 sm:$0xff] %v555_v42  ;;  %v809_v42 = vld [vmem:[%s1624_s1 + $0x400] sm:$0xff] }
 0x162   :  { %832 = vmatpush.msra.mxu1 %v809_v42 }
 0x168   :  { %v605_v44 = vld.sshfl [vmem:[#allocation1] sm:$0xff pattern:$0x75316420] }
 0x169   :  { %982 = vmatmul.msk.f32.vlgmr.msrb.gmra.mxu0 %vm24_vm3, %v605_v44  ;;  %639 = vst [vmem:[#allocation1] ss:$2 sm:$0xff] %v629_v43  ;;  %v808_v43 = vld [vmem:[%s1624_s1 + $0x3f8] sm:$0xff]  ;;  %v850_v44 = vld [vmem:[%s1624_s1 + $0x440] sm:$0xff] }
 0x16a   :  { %641 = vst [vmem:[#allocation1 + $0x1] ss:$2 sm:$0xff] %v631_v45  ;;  %v849_v45 = vld [vmem:[%s1624_s1 + $0x438] sm:$0xff]  ;;  %869 = vmatpush.msra.mxu2 %v850_v44  ;;  %833 = vmatpush.msra.mxu1 %v808_v43 }
 0x16c   :  { %870 = vmatpush.msra.mxu2 %v849_v45 }
 0x16e   :  { %871 = vmatpush.msra.mxu2 %v848_v50 }
 0x170   :  { %872 = vmatpush.msra.mxu2 %v847_v51 }
 0x171   :  { %v642_v47 = vld.sshfl [vmem:[#allocation1] sm:$0xff pattern:$0x75316420] }
 0x172   :  { %983 = vmatmul.msk.f32.vlgmr.msrb.gmra.mxu1 %vm24_vm3, %v642_v47  ;;  %677 = vst [vmem:[#allocation1] ss:$2 sm:$0xff] %v667_v46  ;;  %873 = vmatpush.msra.mxu2 %v846_v52 }
 0x173   :  { %679 = vst [vmem:[#allocation1 + $0x1] ss:$2 sm:$0xff] %v669_v48  ;;  %v807_v48 = vld [vmem:[%s1624_s1 + $0x3f0] sm:$0xff] }
 0x174   :  { %834 = vmatpush.msra.mxu1 %v807_v48  ;;  %874 = vmatpush.msra.mxu2 %v845_v54 }
 0x17a   :  { %v680_v49 = vld.sshfl [vmem:[#allocation1] sm:$0xff pattern:$0x75316420] }
 0x17b   :  { %984 = vmatmul.msk.f32.vlgmr.msrb.gmra.mxu2 %vm24_vm3, %v680_v49  ;;  %v806_v49 = vld [vmem:[%s1624_s1 + $0x3e8] sm:$0xff] }
 0x17c   :  { %835 = vmatpush.msra.mxu1 %v806_v49 }
 0x1bf   :  { %v396_v0 = vpop.f32.mrf.mxu3 }
 0x1c2   :  { %v424_v63 = vpop.f32.mrf.mxu0 }
 0x1c3   :  { %v425_v2 = vadd.f32 %v424_v63, %v396_v0 }
 0x1cb   :  { %v466_v1 = vpop.f32.mrf.mxu1 }
 0x1cc   :  { %v469_v3 = vadd.f32 %v466_v1, %v425_v2  ;;  %v889_v1 = vld [vmem:[%s1624_s1 + $0x460] sm:$0xff]  ;;  %v888_v2 = vld [vmem:[%s1624_s1 + $0x458] sm:$0xff] }
 0x1da   :  { %v509_v5 = vpop.f32.mrf.mxu2 }
 0x1db   :  { %v512_v6 = vadd.f32 %v509_v5, %v469_v3  ;;  %v887_v3 = vld [vmem:[%s1624_s1 + $0x450] sm:$0xff] }
 0x1dd   :  { %v515_v7 = vadd.f32 %v996_v4, %v512_v6  ;;  %v886_v4 = vld [vmem:[%s1624_s1 + $0x448] sm:$0xff] }
 0x1df   :  { %vm516_vm9 = vcmp.ge.f32.partialorder %v515_v7, 0.0  ;;  %v517_v8 = vmul.f32 0.2, %v515_v7 }
 0x1e1   :  { %v518_v9 = vsel %vm516_vm9, %v515_v7, %v517_v8 }
 0x1e2   :  { %980 = vmatmul.msk.f32.vlgmr.msra.gmra.mxu3 %vm529_vm10, %v518_v9 }
 0x1e3   :  { %764 = vmatpush.msra.mxu3 %v744_v26 }
 0x1e5   :  { %765 = vmatpush.msra.mxu3 %v743_v27 }
 0x1e6   :  { %v625_v13 = vpop.f32.mrf.mxu0 }
 0x1e7   :  { %766 = vmatpush.msra.mxu3 %v742_v28 }
 0x1e9   :  { %767 = vmatpush.msra.mxu3 %v741_v30 }
 0x1ea   :  { %981 = vmatmul.msk.f32.vlgmr.msrb.gmra.mxu3 %vm24_vm3, %v577_v41  ;;  %v729_v41 = vld [vmem:[%s1624_s1 + $0x388] sm:$0xff]  ;;  %s923_s1 = sshll.u32 %s1056_s24, 4  ;;  %s924_s1 = int_to_ptr.vmem [resolvable:$true] %s923_s1 }
 0x1eb   :  { %768 = vmatpush.msra.mxu3 %v740_v33  ;;  %797 = vmatpush.msra.mxu0 %v729_v41 }
 0x1ed   :  { %769 = vmatpush.msra.mxu3 %v739_v34 }
 0x1ef   :  { %v662_v16 = vpop.f32.mrf.mxu1  ;;  %908 = vmatpush.msrb.mxu3 %v889_v1 }
 0x1f1   :  { %909 = vmatpush.msrb.mxu3 %v888_v2 }
 0x1f3   :  { %910 = vmatpush.msrb.mxu3 %v887_v3 }
 0x1f5   :  { %911 = vmatpush.msrb.mxu3 %v886_v4 }
 0x1fe   :  { %v700_v19 = vpop.f32.mrf.mxu2 }
 0x265   :  { %v550_v11 = vpop.f32.mrf.mxu3 }
 0x266   :  { %v551_v12 = vadd.f32 %v997_v10, %v550_v11  ;;  %v999_v10 = vld [vmem:[%s1625_s2 + $0x28] ss:$0 sm:$0xff] }
 0x268   :  { %554 = vst.msk [vmem:[#allocation5] sm:$0xff] %vm553_vm11, %v551_v12 }
 0x269   :  { %928 = dma.vmem_to_hbm [thread:$0]  %s924_s1, 128, %s926_s27, [#allocation6]  }
 0x26d   :  { %v597_v14 = vpop.f32.mrf.mxu3 }
 0x26e   :  { %v626_v15 = vadd.f32 %v625_v13, %v597_v14 }
 0x270   :  { %v665_v17 = vadd.f32 %v662_v16, %v626_v15  ;;  %v1000_v16 = vld [vmem:[%s1625_s2 + $0x30] ss:$0 sm:$0xff] }
 0x272   :  { %v703_v20 = vadd.f32 %v700_v19, %v665_v17 }
 0x274   :  { %v706_v21 = vadd.f32 %v998_v18, %v703_v20 }
 0x276   :  { %vm707_vm13 = vcmp.ge.f32.partialorder %v706_v21, 0.0  ;;  %v708_v22 = vmul.f32 0.2, %v706_v21 }
 0x278   :  { %v709_v23 = vsel %vm707_vm13, %v706_v21, %v708_v22 }
 0x279   :  { %v711_v24 = vrot.slane %v709_v23, 4  ;;  %712 = vst [vmem:[#allocation1] ss:$2 sm:$0xff] %v709_v23 }
 0x27b   :  { %715 = vst [vmem:[#allocation1 + $0x10] ss:$2 sm:$0xff] %v711_v24 }
 0x280   :  { %v713_v25 = vld.sshfl [vmem:[#allocation1] sm:$0xff pattern:$0x75316420] }
 0x281   :  { %717 = vrot.lane.b32.xlu2 %v713_v25, %s1054_s7 }
 0x282   :  { %v716_v29 = vld.sshfl [vmem:[#allocation1 + $0x10] sm:$0xff pattern:$0x75316420] }
 0x289   :  { %719 = vrot.lane.b32.xlu2 %v716_v29, %s1054_s7 }
 0x2db   :  { %v718_v40 = vpop.permute.xlu2 %717 }
 0x2dc   :  { %724 = vst.msk [vmem:[#allocation4 + $0x1] sm:$0xf] %vm723_vm14, %v718_v40 }
 0x2e3   :  { %v736_v46 = vld [vmem:[#allocation4 + $0x1] ss:$2 sm:$0x3]  ;;  %v720_v47 = vpop.permute.xlu2 %719  ;;  %v726_v55 = vld [vmem:[#allocation4] ss:$2 sm:$0x3] }
 0x2e4   :  { %747 = vst [vmem:[#allocation1] ss:$4 sm:$0xff] %v736_v46  ;;  %v803_v58 = vld [vmem:[#allocation4 + $0x2] ss:$2 sm:$0x3] }
 0x2e5   :  { %725 = vst.msk [vmem:[#allocation4 + $0x9] sm:$0xf] %vm723_vm14, %v720_v47  ;;  %v842_v61 = vld [vmem:[#allocation4 + $0x3] ss:$2 sm:$0x3] }
 0x2ec   :  { %v738_v53 = vld [vmem:[#allocation4 + $0x9] ss:$2 sm:$0x3]  ;;  %v728_v57 = vld [vmem:[#allocation4 + $0x8] ss:$2 sm:$0x3] }
 0x2ed   :  { %749 = vst [vmem:[#allocation1 + $0x1] ss:$4 sm:$0xff] %v738_v53  ;;  %v805_v60 = vld [vmem:[#allocation4 + $0xa] ss:$2 sm:$0x3] }
 0x2ee   :  { %v844_v63 = vld [vmem:[#allocation4 + $0xb] ss:$2 sm:$0x3] }
 0x2f4   :  { %v750_v56 = vld.sshfl [vmem:[#allocation1] sm:$0xff pattern:$0x73625140] }
 0x2f5   :  { %985 = vmatmul.msk.f32.vlgmr.msra.gmra.mxu3 %vm751_vm15, %v750_v56  ;;  %776 = vst [vmem:[#allocation1] ss:$4 sm:$0xff] %v726_v55 }
 0x2f6   :  { %778 = vst [vmem:[#allocation1 + $0x1] ss:$4 sm:$0xff] %v728_v57 }
 0x2fd   :  { %v779_v59 = vld.sshfl [vmem:[#allocation1] sm:$0xff pattern:$0x73625140] }
 0x2fe   :  { %986 = vmatmul.msk.f32.vlgmr.msra.gmra.mxu0 %vm751_vm15, %v779_v59  ;;  %814 = vst [vmem:[#allocation1] ss:$4 sm:$0xff] %v803_v58 }
 0x2ff   :  { %816 = vst [vmem:[#allocation1 + $0x1] ss:$4 sm:$0xff] %v805_v60 }
 0x306   :  { %v817_v62 = vld.sshfl [vmem:[#allocation1] sm:$0xff pattern:$0x73625140] }
 0x307   :  { %987 = vmatmul.msk.f32.vlgmr.msra.gmra.mxu1 %vm751_vm15, %v817_v62  ;;  %853 = vst [vmem:[#allocation1] ss:$4 sm:$0xff] %v842_v61 }
 0x308   :  { %855 = vst [vmem:[#allocation1 + $0x1] ss:$4 sm:$0xff] %v844_v63 }
 0x30f   :  { %v856_v0 = vld.sshfl [vmem:[#allocation1] sm:$0xff pattern:$0x73625140] }
 0x310   :  { %988 = vmatmul.msk.f32.vlgmr.msra.gmra.mxu2 %vm751_vm15, %v856_v0 }
 0x378   :  { %v771_v6 = vpop.f32.mrf.mxu3 }
 0x37b   :  { %v799_v5 = vpop.f32.mrf.mxu0 }
 0x37c   :  { %v800_v8 = vadd.f32 %v799_v5, %v771_v6 }
 0x384   :  { %v837_v7 = vpop.f32.mrf.mxu1 }
 0x385   :  { %v840_v9 = vadd.f32 %v837_v7, %v800_v8 }
 0x393   :  { %v876_v11 = vpop.f32.mrf.mxu2 }
 0x394   :  { %v879_v12 = vadd.f32 %v876_v11, %v840_v9 }
 0x396   :  { %v882_v13 = vadd.f32 %v999_v10, %v879_v12 }
 0x398   :  { %vm883_vm0 = vcmp.ge.f32.partialorder %v882_v13, 0.0  ;;  %v884_v14 = vmul.f32 0.2, %v882_v13 }
 0x39a   :  { %v885_v15 = vsel %vm883_vm0, %v882_v13, %v884_v14 }
 0x39b   :  { %989 = vmatmul.msk.f32.vlgmr.msrb.gmra.mxu3 %vm892_vm1, %v885_v15 }
 0x41e   :  { %v913_v17 = vpop.f32.mrf.mxu3 }
 0x41f   :  { %v914_v18 = vadd.f32 %v1000_v16, %v913_v17 }
 0x421   :  { %917 = vst.msk [vmem:[#allocation7] sm:$0xf] %vm916_vm2, %v914_v18 }
 0x422   :  { %939 = dma.vmem_to_hbm [thread:$0]  %s935_s30, 64, %s937_s6, [#allocation8]  }
 0x423   :  { %1049 = dma.done.wait [#allocation6], 128  }
 0x424   :  { %1050 = vsyncadd [#allocation6], 4294967168 }
 0x425   :  { %1051 = dma.done.wait [#allocation8], 64  }
 0x426   :  { %1052 = vsyncadd [#allocation8], 4294967232 }
 0x427   :  { %948 = vsyncpa [#allocation6], 1 }
 0x428   :  { %949 = vsyncpa [#allocation8], 1 }

</bundles_post_ra>
